<compile_context>
chip_gen: v6e
topology: v6e:2x2x1
jax: 0.10.0
libtpu: 0.0.40
codegen_flags: <defaults>
</compile_context>

<pallas_src>
import math

import jax
import jax.numpy as jnp
from jax.experimental import pallas as pl
from jax.experimental.pallas import tpu as pltpu

_LANE = 128
_SUBLANE = 8
_H1, _H2 = 400, 300            # logical hidden dims (PyTorch Actor)
_H1_PAD, _H2_PAD = 512, 384    # lane-aligned hidden dims


def _round_up(x, m):
    return ((x + m - 1) // m) * m


def actor_kernel(x_ref, w1_ref, b1_ref, w2_ref, b2_ref, w3_ref, b3_ref, o_ref):
    # Layer 1: Linear + ReLU (x already bf16; f32 MXU accumulation)
    h = jnp.dot(x_ref[...], w1_ref[...], preferred_element_type=jnp.float32)
    h = jnp.maximum(h + b1_ref[...], 0.0)
    # Layer 2: Linear + ReLU
    h = jnp.dot(h.astype(jnp.bfloat16), w2_ref[...],
                preferred_element_type=jnp.float32)
    h = jnp.maximum(h + b2_ref[...], 0.0)
    # Layer 3: Linear + Sigmoid (exp/recip land on the EUP slot)
    h = jnp.dot(h.astype(jnp.bfloat16), w3_ref[...],
                preferred_element_type=jnp.float32)
    o_ref[...] = jax.nn.sigmoid(h + b3_ref[...])


def actor_forward(x, params):
    """x: (B, state_dim) float32. params: output of init_actor_params (pre-padded)."""
    w1, b1 = params["w1"], params["b1"]
    w2, b2 = params["w2"], params["b2"]
    w3, b3 = params["w3"], params["b3"]
    state_dim = params["state_dim"]
    action_dim = params["action_dim"]

    B = x.shape[0]
    s_pad = w1.shape[0]
    a_pad = w3.shape[1]

    # ---- Batch tiling ------------------------------------------------------
    if B <= _LANE:
        # Inference path: single full-batch block (weight-DMA / launch bound).
        block_b = _round_up(max(B, _SUBLANE), _SUBLANE)
        b_pad = block_b
    else:
        # Training path: big M tiles to amortize per-step overhead, but keep
        # >= 2 grid steps so both v7x TensorCores get work.
        target = 1024 if B >= 2048 else 512
        half = _round_up(-(-B // 2), _LANE)
        block_b = max(_LANE, min(target, half))
        b_pad = _round_up(B, block_b)

    # VMEM budget scales with the batch tile (live footprint ~4 MiB @ 512).
    if block_b >= 1024:
        vmem_limit = 32 << 20
    elif block_b > _LANE:
        vmem_limit = 16 << 20
    else:
        vmem_limit = 8 << 20

    # ---- Stream x as bf16, pad only if needed ------------------------------
    x_in = x.astype(jnp.bfloat16)
    if b_pad != B or s_pad != state_dim:
        x_in = jnp.pad(x_in, ((0, b_pad - B), (0, s_pad - state_dim)))

    def run(single_buffer_weights):
        def resident(shape):
            # Whole array, constant block index -> stays VMEM-resident.
            kwargs = {}
            if single_buffer_weights:
                kwargs["pipeline_mode"] = pl.Buffered(1)
            return pl.BlockSpec(shape, lambda i, n=len(shape): (0,) * n, **kwargs)

        return pl.pallas_call(
            actor_kernel,
            out_shape=jax.ShapeDtypeStruct((b_pad, a_pad), jnp.float32),
            grid=(b_pad // block_b,),
            in_specs=[
                pl.BlockSpec((block_b, s_pad), lambda i: (i, 0)),
                resident(w1.shape), resident(b1.shape),
                resident(w2.shape), resident(b2.shape),
                resident(w3.shape), resident(b3.shape),
            ],
            out_specs=pl.BlockSpec((block_b, a_pad), lambda i: (i, 0)),
            compiler_params=pltpu.CompilerParams(
                dimension_semantics=("parallel",),
                vmem_limit_bytes=vmem_limit,
            ),
        )(x_in, w1, b1, w2, b2, w3, b3)

    try:
        out_pad = jax.block_until_ready(run(True))
    except Exception:
        # pl.Buffered(1) unsupported on this jax version -> default pipelining.
        out_pad = run(False)

    if b_pad == B and a_pad == action_dim:
        return out_pad
    return out_pad[:B, :action_dim]


def init_actor_params(key, state_dim, action_dim):
    """PyTorch nn.Linear-style init: U(-1/sqrt(fan_in), 1/sqrt(fan_in)).

    Weights are stored (in, out) — the transpose of nn.Linear.weight — then
    zero-padded once to lane-aligned shapes and cast to bf16. Biases stay f32.
    """
    s_pad = _round_up(state_dim, _LANE)
    a_pad = _round_up(action_dim, _LANE)

    def linear(key, fan_in, fan_out, in_pad, out_pad):
        kw, kb = jax.random.split(key)
        bound = 1.0 / math.sqrt(fan_in)
        w = jax.random.uniform(kw, (fan_in, fan_out), jnp.float32, -bound, bound)
        b = jax.random.uniform(kb, (1, fan_out), jnp.float32, -bound, bound)
        w = jnp.pad(w, ((0, in_pad - fan_in), (0, out_pad - fan_out)))
        b = jnp.pad(b, ((0, 0), (0, out_pad - fan_out)))
        return w.astype(jnp.bfloat16), b

    k1, k2, k3 = jax.random.split(key, 3)
    w1, b1 = linear(k1, state_dim, _H1, s_pad, _H1_PAD)
    w2, b2 = linear(k2, _H1, _H2, _H1_PAD, _H2_PAD)
    w3, b3 = linear(k3, _H2, action_dim, _H2_PAD, a_pad)
    return {"w1": w1, "b1": b1, "w2": w2, "b2": b2, "w3": w3, "b3": b3,
            "state_dim": int(state_dim), "action_dim": int(action_dim)}


def _reference(x, p):
    """Pure-JAX reference performing the identical padded / bf16-weight math."""
    s_pad = p["w1"].shape[0]
    xp = jnp.pad(x, ((0, 0), (0, s_pad - x.shape[1]))).astype(jnp.bfloat16)
    h = jnp.maximum(jnp.dot(xp, p["w1"],
                            preferred_element_type=jnp.float32) + p["b1"], 0.0)
    h = jnp.maximum(jnp.dot(h.astype(jnp.bfloat16), p["w2"],
                            preferred_element_type=jnp.float32) + p["b2"], 0.0)
    h = jnp.dot(h.astype(jnp.bfloat16), p["w3"],
                preferred_element_type=jnp.float32) + p["b3"]
    return jax.nn.sigmoid(h)[:, :p["action_dim"]]


if __name__ == "__main__":
    key = jax.random.PRNGKey(0)
    k_params, k_x1, k_x2 = jax.random.split(key, 3)

    state_dim = 16
    action_dim = 4

    params = init_actor_params(k_params, state_dim, action_dim)

    # Small inference-style batch (single grid step).
    x_small = jax.random.normal(k_x1, (2, state_dim), jnp.float32)
    out_small = jax.block_until_ready(actor_forward(x_small, params))
    exp_small = _reference(x_small, params)
    assert out_small.shape == (2, action_dim), out_small.shape
    assert jnp.allclose(out_small, exp_small, atol=2e-3, rtol=2e-3)

    # Multi-step grid path (B > 128 -> >= 2 parallel grid steps).
    x_big = jax.random.normal(k_x2, (260, state_dim), jnp.float32)
    out_big = jax.block_until_ready(actor_forward(x_big, params))
    exp_big = _reference(x_big, params)
    assert out_big.shape == (260, action_dim), out_big.shape
    assert jnp.allclose(out_big, exp_big, atol=2e-3, rtol=2e-3)

    print("KERNEL_OK")
</pallas_src>

<mosaic_0001>
module attributes {stable_mosaic.version = 11 : i64} {
  func.func @actor_kernel(%arg0: i32, %arg1: memref<8x128xbf16, #tpu.memory_space<vmem>>, %arg2: memref<128x512xbf16, #tpu.memory_space<vmem>>, %arg3: memref<1x512xf32, #tpu.memory_space<vmem>>, %arg4: memref<512x384xbf16, #tpu.memory_space<vmem>>, %arg5: memref<1x384xf32, #tpu.memory_space<vmem>>, %arg6: memref<384x128xbf16, #tpu.memory_space<vmem>>, %arg7: memref<1x128xf32, #tpu.memory_space<vmem>>, %arg8: memref<8x128xf32, #tpu.memory_space<vmem>>) attributes {dimension_semantics = [#tpu.dimension_semantics<parallel>], iteration_bounds = array<i64: 1>, scalar_prefetch = 0 : i64, scratch_operands = 0 : i64, tpu.core_type = #tpu.core_type<tc>, window_params = [{transform_indices = @transform_0, window_bounds = array<i64: 8, 128>}, {pipeline_mode = #tpu.pipeline_mode<synchronous>, transform_indices = @transform_1, window_bounds = array<i64: 128, 512>}, {pipeline_mode = #tpu.pipeline_mode<synchronous>, transform_indices = @transform_2, window_bounds = array<i64: 1, 512>}, {pipeline_mode = #tpu.pipeline_mode<synchronous>, transform_indices = @transform_3, window_bounds = array<i64: 512, 384>}, {pipeline_mode = #tpu.pipeline_mode<synchronous>, transform_indices = @transform_4, window_bounds = array<i64: 1, 384>}, {pipeline_mode = #tpu.pipeline_mode<synchronous>, transform_indices = @transform_5, window_bounds = array<i64: 384, 128>}, {pipeline_mode = #tpu.pipeline_mode<synchronous>, transform_indices = @transform_6, window_bounds = array<i64: 1, 128>}, {transform_indices = @transform_7, window_bounds = array<i64: 8, 128>}]} {
    %c0 = arith.constant 0 : index
    %c0_0 = arith.constant 0 : index
    %0 = vector.load %arg1[%c0, %c0_0] : memref<8x128xbf16, #tpu.memory_space<vmem>>, vector<8x128xbf16>
    %c0_1 = arith.constant 0 : index
    %c0_2 = arith.constant 0 : index
    %1 = vector.load %arg2[%c0_1, %c0_2] : memref<128x512xbf16, #tpu.memory_space<vmem>>, vector<128x512xbf16>
    %cst = arith.constant dense<0.000000e+00> : vector<8x512xf32>
    %2 = tpu.matmul %0, %1, %cst {dimension_numbers = #tpu.dot_dimension_numbers<[1], [0], [0], [1], [0, 0, 1, 1], [], []>} : vector<8x128xbf16>, vector<128x512xbf16>, vector<8x512xf32> -> vector<8x512xf32>
    %c0_3 = arith.constant 0 : index
    %c0_4 = arith.constant 0 : index
    %3 = vector.load %arg3[%c0_3, %c0_4] : memref<1x512xf32, #tpu.memory_space<vmem>>, vector<1x512xf32>
    %4 = vector.broadcast %3 : vector<1x512xf32> to vector<8x512xf32>
    %5 = arith.addf %2, %4 : vector<8x512xf32>
    %cst_5 = arith.constant 0.000000e+00 : f32
    %6 = vector.broadcast %cst_5 : f32 to vector<8x512xf32>
    %7 = arith.maximumf %5, %6 : vector<8x512xf32>
    %8 = arith.truncf %7 : vector<8x512xf32> to vector<8x512xbf16>
    %c0_6 = arith.constant 0 : index
    %c0_7 = arith.constant 0 : index
    %9 = vector.load %arg4[%c0_6, %c0_7] : memref<512x384xbf16, #tpu.memory_space<vmem>>, vector<512x384xbf16>
    %cst_8 = arith.constant dense<0.000000e+00> : vector<8x384xf32>
    %10 = tpu.matmul %8, %9, %cst_8 {dimension_numbers = #tpu.dot_dimension_numbers<[1], [0], [0], [1], [0, 0, 1, 1], [], []>} : vector<8x512xbf16>, vector<512x384xbf16>, vector<8x384xf32> -> vector<8x384xf32>
    %c0_9 = arith.constant 0 : index
    %c0_10 = arith.constant 0 : index
    %11 = vector.load %arg5[%c0_9, %c0_10] : memref<1x384xf32, #tpu.memory_space<vmem>>, vector<1x384xf32>
    %12 = vector.broadcast %11 : vector<1x384xf32> to vector<8x384xf32>
    %13 = arith.addf %10, %12 : vector<8x384xf32>
    %cst_11 = arith.constant 0.000000e+00 : f32
    %14 = vector.broadcast %cst_11 : f32 to vector<8x384xf32>
    %15 = arith.maximumf %13, %14 : vector<8x384xf32>
    %16 = arith.truncf %15 : vector<8x384xf32> to vector<8x384xbf16>
    %c0_12 = arith.constant 0 : index
    %c0_13 = arith.constant 0 : index
    %17 = vector.load %arg6[%c0_12, %c0_13] : memref<384x128xbf16, #tpu.memory_space<vmem>>, vector<384x128xbf16>
    %cst_14 = arith.constant dense<0.000000e+00> : vector<8x128xf32>
    %18 = tpu.matmul %16, %17, %cst_14 {dimension_numbers = #tpu.dot_dimension_numbers<[1], [0], [0], [1], [0, 0, 1, 1], [], []>} : vector<8x384xbf16>, vector<384x128xbf16>, vector<8x128xf32> -> vector<8x128xf32>
    %c0_15 = arith.constant 0 : index
    %c0_16 = arith.constant 0 : index
    %19 = vector.load %arg7[%c0_15, %c0_16] : memref<1x128xf32, #tpu.memory_space<vmem>>, vector<1x128xf32>
    %20 = vector.broadcast %19 : vector<1x128xf32> to vector<8x128xf32>
    %21 = arith.addf %18, %20 : vector<8x128xf32>
    %22 = arith.negf %21 : vector<8x128xf32>
    %23 = math.exp %22 : vector<8x128xf32>
    %cst_17 = arith.constant 1.000000e+00 : f32
    %24 = vector.broadcast %cst_17 : f32 to vector<8x128xf32>
    %25 = arith.addf %24, %23 : vector<8x128xf32>
    %26 = arith.divf %24, %25 : vector<8x128xf32>
    %c0_18 = arith.constant 0 : index
    %c0_19 = arith.constant 0 : index
    %27 = vector.load %arg8[%c0_18, %c0_19] : memref<8x128xf32, #tpu.memory_space<vmem>>, vector<8x128xf32>
    tpu.vector_store %arg8[%c0_18, %c0_19], %26 {strides = array<i32>} : memref<8x128xf32, #tpu.memory_space<vmem>>, vector<8x128xf32>,
    return
  }
  func.func @transform_0(%arg0: i32) -> (i32, i32) {
    %c0_i32 = arith.constant 0 : i32
    %c0_i32_0 = arith.constant 0 : i32
    return %arg0, %c0_i32 : i32, i32
  }
  func.func @transform_1(%arg0: i32) -> (i32, i32) {
    %c0_i32 = arith.constant 0 : i32
    %c0_i32_0 = arith.constant 0 : i32
    %c0_i32_1 = arith.constant 0 : i32
    return %c0_i32, %c0_i32_0 : i32, i32
  }
  func.func @transform_2(%arg0: i32) -> (i32, i32) {
    %c0_i32 = arith.constant 0 : i32
    %c0_i32_0 = arith.constant 0 : i32
    %c0_i32_1 = arith.constant 0 : i32
    return %c0_i32, %c0_i32_0 : i32, i32
  }
  func.func @transform_3(%arg0: i32) -> (i32, i32) {
    %c0_i32 = arith.constant 0 : i32
    %c0_i32_0 = arith.constant 0 : i32
    %c0_i32_1 = arith.constant 0 : i32
    return %c0_i32, %c0_i32_0 : i32, i32
  }
  func.func @transform_4(%arg0: i32) -> (i32, i32) {
    %c0_i32 = arith.constant 0 : i32
    %c0_i32_0 = arith.constant 0 : i32
    %c0_i32_1 = arith.constant 0 : i32
    return %c0_i32, %c0_i32_0 : i32, i32
  }
  func.func @transform_5(%arg0: i32) -> (i32, i32) {
    %c0_i32 = arith.constant 0 : i32
    %c0_i32_0 = arith.constant 0 : i32
    %c0_i32_1 = arith.constant 0 : i32
    return %c0_i32, %c0_i32_0 : i32, i32
  }
  func.func @transform_6(%arg0: i32) -> (i32, i32) {
    %c0_i32 = arith.constant 0 : i32
    %c0_i32_0 = arith.constant 0 : i32
    %c0_i32_1 = arith.constant 0 : i32
    return %c0_i32, %c0_i32_0 : i32, i32
  }
  func.func @transform_7(%arg0: i32) -> (i32, i32) {
    %c0_i32 = arith.constant 0 : i32
    %c0_i32_0 = arith.constant 0 : i32
    return %arg0, %c0_i32 : i32, i32
  }
}

module attributes {stable_mosaic.version = 11 : i64} {
  func.func @actor_kernel(%arg0: i32, %arg1: memref<8x128xbf16, #tpu.memory_space<vmem>>, %arg2: memref<128x512xbf16, #tpu.memory_space<vmem>>, %arg3: memref<1x512xf32, #tpu.memory_space<vmem>>, %arg4: memref<512x384xbf16, #tpu.memory_space<vmem>>, %arg5: memref<1x384xf32, #tpu.memory_space<vmem>>, %arg6: memref<384x128xbf16, #tpu.memory_space<vmem>>, %arg7: memref<1x128xf32, #tpu.memory_space<vmem>>, %arg8: memref<8x128xf32, #tpu.memory_space<vmem>>) attributes {dimension_semantics = [#tpu.dimension_semantics<parallel>], iteration_bounds = array<i64: 1>, scalar_prefetch = 0 : i64, scratch_operands = 0 : i64, tpu.core_type = #tpu.core_type<tc>, window_params = [{transform_indices = @transform_0, window_bounds = array<i64: 8, 128>}, {pipeline_mode = #tpu.pipeline_mode<synchronous>, transform_indices = @transform_1, window_bounds = array<i64: 128, 512>}, {pipeline_mode = #tpu.pipeline_mode<synchronous>, transform_indices = @transform_2, window_bounds = array<i64: 1, 512>}, {pipeline_mode = #tpu.pipeline_mode<synchronous>, transform_indices = @transform_3, window_bounds = array<i64: 512, 384>}, {pipeline_mode = #tpu.pipeline_mode<synchronous>, transform_indices = @transform_4, window_bounds = array<i64: 1, 384>}, {pipeline_mode = #tpu.pipeline_mode<synchronous>, transform_indices = @transform_5, window_bounds = array<i64: 384, 128>}, {pipeline_mode = #tpu.pipeline_mode<synchronous>, transform_indices = @transform_6, window_bounds = array<i64: 1, 128>}, {transform_indices = @transform_7, window_bounds = array<i64: 8, 128>}]} {
    %c0 = arith.constant 0 : index
    %c0_0 = arith.constant 0 : index
    %0 = vector.load %arg1[%c0, %c0_0] : memref<8x128xbf16, #tpu.memory_space<vmem>>, vector<8x128xbf16>
    %c0_1 = arith.constant 0 : index
    %c0_2 = arith.constant 0 : index
    %1 = vector.load %arg2[%c0_1, %c0_2] : memref<128x512xbf16, #tpu.memory_space<vmem>>, vector<128x512xbf16>
    %cst = arith.constant dense<0.000000e+00> : vector<8x512xf32>
    %2 = tpu.matmul %0, %1, %cst {dimension_numbers = #tpu.dot_dimension_numbers<[1], [0], [0], [1], [0, 0, 1, 1], [], []>} : vector<8x128xbf16>, vector<128x512xbf16>, vector<8x512xf32> -> vector<8x512xf32>
    %c0_3 = arith.constant 0 : index
    %c0_4 = arith.constant 0 : index
    %3 = vector.load %arg3[%c0_3, %c0_4] : memref<1x512xf32, #tpu.memory_space<vmem>>, vector<1x512xf32>
    %4 = vector.broadcast %3 : vector<1x512xf32> to vector<8x512xf32>
    %5 = arith.addf %2, %4 : vector<8x512xf32>
    %cst_5 = arith.constant 0.000000e+00 : f32
    %6 = vector.broadcast %cst_5 : f32 to vector<8x512xf32>
    %7 = arith.maximumf %5, %6 : vector<8x512xf32>
    %8 = arith.truncf %7 : vector<8x512xf32> to vector<8x512xbf16>
    %c0_6 = arith.constant 0 : index
    %c0_7 = arith.constant 0 : index
    %9 = vector.load %arg4[%c0_6, %c0_7] : memref<512x384xbf16, #tpu.memory_space<vmem>>, vector<512x384xbf16>
    %cst_8 = arith.constant dense<0.000000e+00> : vector<8x384xf32>
    %10 = tpu.matmul %8, %9, %cst_8 {dimension_numbers = #tpu.dot_dimension_numbers<[1], [0], [0], [1], [0, 0, 1, 1], [], []>} : vector<8x512xbf16>, vector<512x384xbf16>, vector<8x384xf32> -> vector<8x384xf32>
    %c0_9 = arith.constant 0 : index
    %c0_10 = arith.constant 0 : index
    %11 = vector.load %arg5[%c0_9, %c0_10] : memref<1x384xf32, #tpu.memory_space<vmem>>, vector<1x384xf32>
    %12 = vector.broadcast %11 : vector<1x384xf32> to vector<8x384xf32>
    %13 = arith.addf %10, %12 : vector<8x384xf32>
    %cst_11 = arith.constant 0.000000e+00 : f32
    %14 = vector.broadcast %cst_11 : f32 to vector<8x384xf32>
    %15 = arith.maximumf %13, %14 : vector<8x384xf32>
    %16 = arith.truncf %15 : vector<8x384xf32> to vector<8x384xbf16>
    %c0_12 = arith.constant 0 : index
    %c0_13 = arith.constant 0 : index
    %17 = vector.load %arg6[%c0_12, %c0_13] : memref<384x128xbf16, #tpu.memory_space<vmem>>, vector<384x128xbf16>
    %cst_14 = arith.constant dense<0.000000e+00> : vector<8x128xf32>
    %18 = tpu.matmul %16, %17, %cst_14 {dimension_numbers = #tpu.dot_dimension_numbers<[1], [0], [0], [1], [0, 0, 1, 1], [], []>} : vector<8x384xbf16>, vector<384x128xbf16>, vector<8x128xf32> -> vector<8x128xf32>
    %c0_15 = arith.constant 0 : index
    %c0_16 = arith.constant 0 : index
    %19 = vector.load %arg7[%c0_15, %c0_16] : memref<1x128xf32, #tpu.memory_space<vmem>>, vector<1x128xf32>
    %20 = vector.broadcast %19 : vector<1x128xf32> to vector<8x128xf32>
    %21 = arith.addf %18, %20 : vector<8x128xf32>
    %22 = arith.negf %21 : vector<8x128xf32>
    %23 = math.exp %22 : vector<8x128xf32>
    %cst_17 = arith.constant 1.000000e+00 : f32
    %24 = vector.broadcast %cst_17 : f32 to vector<8x128xf32>
    %25 = arith.addf %24, %23 : vector<8x128xf32>
    %26 = arith.divf %24, %25 : vector<8x128xf32>
    %c0_18 = arith.constant 0 : index
    %c0_19 = arith.constant 0 : index
    %27 = vector.load %arg8[%c0_18, %c0_19] : memref<8x128xf32, #tpu.memory_space<vmem>>, vector<8x128xf32>
    tpu.vector_store %arg8[%c0_18, %c0_19], %26 {strides = array<i32>} : memref<8x128xf32, #tpu.memory_space<vmem>>, vector<8x128xf32>,
    return
  }
  func.func @transform_0(%arg0: i32) -> (i32, i32) {
    %c0_i32 = arith.constant 0 : i32
    %c0_i32_0 = arith.constant 0 : i32
    return %arg0, %c0_i32 : i32, i32
  }
  func.func @transform_1(%arg0: i32) -> (i32, i32) {
    %c0_i32 = arith.constant 0 : i32
    %c0_i32_0 = arith.constant 0 : i32
    %c0_i32_1 = arith.constant 0 : i32
    return %c0_i32, %c0_i32_0 : i32, i32
  }
  func.func @transform_2(%arg0: i32) -> (i32, i32) {
    %c0_i32 = arith.constant 0 : i32
    %c0_i32_0 = arith.constant 0 : i32
    %c0_i32_1 = arith.constant 0 : i32
    return %c0_i32, %c0_i32_0 : i32, i32
  }
  func.func @transform_3(%arg0: i32) -> (i32, i32) {
    %c0_i32 = arith.constant 0 : i32
    %c0_i32_0 = arith.constant 0 : i32
    %c0_i32_1 = arith.constant 0 : i32
    return %c0_i32, %c0_i32_0 : i32, i32
  }
  func.func @transform_4(%arg0: i32) -> (i32, i32) {
    %c0_i32 = arith.constant 0 : i32
    %c0_i32_0 = arith.constant 0 : i32
    %c0_i32_1 = arith.constant 0 : i32
    return %c0_i32, %c0_i32_0 : i32, i32
  }
  func.func @transform_5(%arg0: i32) -> (i32, i32) {
    %c0_i32 = arith.constant 0 : i32
    %c0_i32_0 = arith.constant 0 : i32
    %c0_i32_1 = arith.constant 0 : i32
    return %c0_i32, %c0_i32_0 : i32, i32
  }
  func.func @transform_6(%arg0: i32) -> (i32, i32) {
    %c0_i32 = arith.constant 0 : i32
    %c0_i32_0 = arith.constant 0 : i32
    %c0_i32_1 = arith.constant 0 : i32
    return %c0_i32, %c0_i32_0 : i32, i32
  }
  func.func @transform_7(%arg0: i32) -> (i32, i32) {
    %c0_i32 = arith.constant 0 : i32
    %c0_i32_0 = arith.constant 0 : i32
    return %arg0, %c0_i32 : i32, i32
  }
}

</mosaic_0001>

<bundles_post_ra>
// kernel: tpu_custom_call.1
= control target key start
LH: loop header
LB: loop body
LE: loop exit
PB: predicated region body
PF: predicated region fallthrough
CT: control target
= control target key end

     0   :  { %12 = vsyncpa [#allocation3], 0  ;;  %s2226_s0 = inlined_call_operand.hbm [shape: bf16[8,128], index: 0, kind: input, shape index: {}]   ;;  %s2227_s1 = inlined_call_operand.hbm [shape: bf16[128,512], index: 1, kind: input, shape index: {}]   ;;  %s2228_s2 = inlined_call_operand.hbm [shape: f32[1,512], index: 2, kind: input, shape index: {}]   ;;  %s2229_s3 = inlined_call_operand.hbm [shape: bf16[512,384], index: 3, kind: input, shape index: {}]   ;;  %s2230_s4 = inlined_call_operand.vmem [shape: f32[1,384], index: 4, kind: input, shape index: {}]   ;;  %s2231_s5 = inlined_call_operand.hbm [shape: bf16[384,128], index: 5, kind: input, shape index: {}]   ;;  %s2232_s6 = inlined_call_operand.vmem [shape: f32[1,128], index: 6, kind: input, shape index: {}]   ;;  %s2233_s7 = inlined_call_operand.hbm [shape: f32[8,128], index: 7, kind: output, shape index: {}]  }
   0x1   :  { %13 = vsyncpa [#allocation6], 0 }
   0x2   :  { %14 = vsyncpa [#allocation9], 0 }
   0x3   :  { %15 = vsyncpa [#allocation4], 0  ;;  %s2121_s24 = smov [#allocation5]  }
   0x4   :  { %s31_s25 = sshll.u32 %s2121_s24, 4  ;;  %s32_s25 = int_to_ptr.vmem [resolvable:$true] %s31_s25 }
   0x5   :  { %s2001_s26 = scalar_lea.vmem %s32_s25, 4096  ;;  %p2006_p1 = scmp.lt.s32.totalorder %s32_s25, %s32_s25 }
   0x6   :  { %p2002_p0 = scmp.ne.s32.totalorder %s32_s25, %s2001_s26  ;;  %p2007_p2 = scmp.lt.s32.totalorder %s2001_s26, %s2001_s26 }
   0x8   :  { %p2008_p3 = por %p2007_p2, %p2006_p1 }
   0xa   :  { %p2009_p4 = pnand %p2008_p3, %p2002_p0 }
   0xc   :  { %2012 = shalt.err (!%p2009_p4)
}
   0xd   :  { %s2122_s27 = smov 256   ;;  %s2123_s28 = smov 16  }
   0xe   :  { %37 = dma.hbm_to_vmem [thread:$0]  %s2227_s1, 4096, %s32_s25, [#allocation6], %s2122_s27, %s2122_s27, %s2123_s28  }
   0xf   :  { %s2124_s8 = smov [#allocation8]  }
  0x10   :  { %s53_s9 = sshll.u32 %s2124_s8, 4  ;;  %s54_s9 = int_to_ptr.vmem [resolvable:$true] %s53_s9 }
  0x11   :  { %s2021_s10 = scalar_lea.vmem %s54_s9, 12288  ;;  %p2026_p6 = scmp.lt.s32.totalorder %s54_s9, %s54_s9 }
  0x12   :  { %p2022_p5 = scmp.ne.s32.totalorder %s54_s9, %s2021_s10  ;;  %p2027_p7 = scmp.lt.s32.totalorder %s2021_s10, %s2021_s10 }
  0x14   :  { %p2028_p8 = por %p2027_p7, %p2026_p6 }
  0x16   :  { %p2029_p9 = pnand %p2028_p8, %p2022_p5 }
  0x18   :  { %2032 = shalt.err (!%p2029_p9)
}
  0x19   :  { %s2125_s11 = smov 192   ;;  %s2126_s12 = smov 12  }
  0x1a   :  { %59 = dma.hbm_to_vmem [thread:$0]  %s2229_s3, 12288, %s54_s9, [#allocation9], %s2125_s11, %s2125_s11, %s2126_s12  }
  0x1b   :  { %s2127_s15 = smov [#allocation2]   ;;  %s2128_s17 = smov [#allocation7]  }
  0x1c   :  { %s22_s16 = sshll.u32 %s2127_s15, 4  ;;  %s44_s1 = sshll.u32 %s2128_s17, 4  ;;  %s23_s16 = int_to_ptr.vmem [resolvable:$true] %s22_s16  ;;  %s45_s1 = int_to_ptr.vmem [resolvable:$true] %s44_s1 }
  0x1d   :  { %s2041_s18 = scalar_lea.vmem %s23_s16, 64  ;;  %p2046_p11 = scmp.lt.s32.totalorder %s23_s16, %s23_s16 }
  0x1e   :  { %p2042_p10 = scmp.ne.s32.totalorder %s23_s16, %s2041_s18  ;;  %p2047_p12 = scmp.lt.s32.totalorder %s2041_s18, %s2041_s18 }
  0x20   :  { %p2048_p13 = por %p2047_p12, %p2046_p11 }
  0x22   :  { %p2049_p0 = pnand %p2048_p13, %p2042_p10 }
  0x24   :  { %2052 = shalt.err (!%p2049_p0)
}
  0x25   :  { %25 = dma.hbm_to_vmem [thread:$0]  %s2226_s0, 64, %s23_s16, [#allocation3]  }
  0x26   :  { %s2061_s21 = scalar_lea.vmem %s45_s1, 64  ;;  %p2066_p2 = scmp.lt.s32.totalorder %s45_s1, %s45_s1 }
  0x27   :  { %p2062_p1 = scmp.ne.s32.totalorder %s45_s1, %s2061_s21  ;;  %p2067_p3 = scmp.lt.s32.totalorder %s2061_s21, %s2061_s21 }
  0x29   :  { %p2068_p4 = por %p2067_p3, %p2066_p2 }
  0x2b   :  { %p2069_p5 = pnand %p2068_p4, %p2062_p1 }
  0x2d   :  { %2072 = shalt.err (!%p2069_p5)
}
  0x2e   :  { %47 = dma.hbm_to_vmem [thread:$0]  %s2228_s2, 64, %s45_s1, [#allocation6]  }
  0x2f   :  { %s2129_s23 = smov [#allocation10]  }
  0x30   :  { %s67_s24 = sshll.u32 %s2129_s23, 4  ;;  %s68_s24 = int_to_ptr.vmem [resolvable:$true] %s67_s24 }
  0x31   :  { %s2081_s25 = scalar_lea.vmem %s68_s24, 3072  ;;  %p2086_p7 = scmp.lt.s32.totalorder %s68_s24, %s68_s24 }
  0x32   :  { %p2082_p6 = scmp.ne.s32.totalorder %s68_s24, %s2081_s25  ;;  %p2087_p8 = scmp.lt.s32.totalorder %s2081_s25, %s2081_s25 }
  0x34   :  { %p2088_p9 = por %p2087_p8, %p2086_p7 }
  0x36   :  { %p2089_p10 = pnand %p2088_p9, %p2082_p6 }
  0x38   :  { %2092 = shalt.err (!%p2089_p10)
}
  0x39   :  { %s2130_s0 = smov 64   ;;  %s2131_s26 = smov 4  }
  0x3a   :  { %73 = dma.hbm_to_vmem [thread:$0]  %s2231_s5, 3072, %s68_s24, [#allocation9], %s2130_s0, %s2130_s0, %s2131_s26  }
  0x3b   :  { %2113 = dma.done.wait [#allocation3], 64  }
  0x3c   :  { %2114 = vsyncadd [#allocation3], 4294967232 }
  0x3d   :  { %2115 = dma.done.wait [#allocation6], 4160  }
  0x3e   :  { %2116 = vsyncadd [#allocation6], 4294963136 }
  0x3f   :  { %2117 = dma.done.wait [#allocation9], 15360  }
  0x40   :  { %2118 = vsyncadd [#allocation9], 4294951936  ;;  %v2132_v0 = vmov 0   ;;  %v1789_v1 = vld [vmem:[#allocation5 + $0xe4] ss:$16 sps:$4 sm:$0xff]   ;;  %vm2134_vm0 = vmmov 0  }
  0x41   :  { %339 = vmatprep.mubr.bf16.mxu0 %v2132_v0  ;;  %380 = vmatprep.mubr.bf16.mxu1 %v2132_v0  ;;  %v1791_v2 = vld [vmem:[#allocation5 + $0xec] ss:$16 sps:$4 sm:$0xff]   ;;  %v1793_v3 = vld [vmem:[#allocation5 + $0xe0] ss:$16 sps:$4 sm:$0xff]   ;;  %v1794_v4 = vld [vmem:[#allocation5 + $0xe8] ss:$16 sps:$4 sm:$0xff]  }
  0x42   :  { %307 = vmatprep.subr.bf16.mxu0 %v1789_v1  ;;  %348 = vmatprep.subr.bf16.mxu1 %v1791_v2  ;;  %v1795_v5 = vld [vmem:[#allocation5 + $0xc4] ss:$16 sps:$4 sm:$0xff]   ;;  %v1797_v6 = vld [vmem:[#allocation5 + $0xcc] ss:$16 sps:$4 sm:$0xff]   ;;  %v1799_v7 = vld [vmem:[#allocation5 + $0xc0] ss:$16 sps:$4 sm:$0xff]  }
  0x43   :  { %308 = vmatpush1.bf16.msra.mxu0 %v1793_v3  ;;  %349 = vmatpush1.bf16.msra.mxu1 %v1794_v4  ;;  %v1800_v8 = vld [vmem:[#allocation5 + $0xc8] ss:$16 sps:$4 sm:$0xff]   ;;  %v1801_v9 = vld [vmem:[#allocation5 + $0xa4] ss:$16 sps:$4 sm:$0xff]   ;;  %v1803_v10 = vld [vmem:[#allocation5 + $0xac] ss:$16 sps:$4 sm:$0xff]  }
  0x44   :  { %309 = vmatprep.subr.bf16.mxu0 %v1795_v5  ;;  %350 = vmatprep.subr.bf16.mxu1 %v1797_v6  ;;  %v1805_v11 = vld [vmem:[#allocation5 + $0xa0] ss:$16 sps:$4 sm:$0xff]   ;;  %v1806_v12 = vld [vmem:[#allocation5 + $0xa8] ss:$16 sps:$4 sm:$0xff]   ;;  %v1807_v13 = vld [vmem:[#allocation5 + $0x84] ss:$16 sps:$4 sm:$0xff]  }
  0x45   :  { %v1809_v14 = vld [vmem:[#allocation5 + $0x8c] ss:$16 sps:$4 sm:$0xff]   ;;  %v1811_v15 = vld [vmem:[#allocation5 + $0x80] ss:$16 sps:$4 sm:$0xff]   ;;  %v1812_v16 = vld [vmem:[#allocation5 + $0x88] ss:$16 sps:$4 sm:$0xff]  }
  0x46   :  { %v1813_v17 = vld [vmem:[#allocation5 + $0x64] ss:$16 sps:$4 sm:$0xff]   ;;  %v1815_v18 = vld [vmem:[#allocation5 + $0x6c] ss:$16 sps:$4 sm:$0xff]   ;;  %v1817_v19 = vld [vmem:[#allocation5 + $0x60] ss:$16 sps:$4 sm:$0xff]  }
  0x47   :  { %310 = vmatpush1.bf16.msra.mxu0 %v1799_v7  ;;  %351 = vmatpush1.bf16.msra.mxu1 %v1800_v8  ;;  %v1818_v20 = vld [vmem:[#allocation5 + $0x68] ss:$16 sps:$4 sm:$0xff]   ;;  %v1819_v21 = vld [vmem:[#allocation5 + $0x44] ss:$16 sps:$4 sm:$0xff]   ;;  %v1821_v22 = vld [vmem:[#allocation5 + $0x4c] ss:$16 sps:$4 sm:$0xff]  }
  0x48   :  { %311 = vmatprep.subr.bf16.mxu0 %v1801_v9  ;;  %352 = vmatprep.subr.bf16.mxu1 %v1803_v10  ;;  %v1823_v23 = vld [vmem:[#allocation5 + $0x40] ss:$16 sps:$4 sm:$0xff]   ;;  %v1824_v24 = vld [vmem:[#allocation5 + $0x48] ss:$16 sps:$4 sm:$0xff]   ;;  %v1825_v25 = vld [vmem:[#allocation5 + $0x24] ss:$16 sps:$4 sm:$0xff]  }
  0x49   :  { %v1827_v26 = vld [vmem:[#allocation5 + $0x2c] ss:$16 sps:$4 sm:$0xff]   ;;  %v1829_v27 = vld [vmem:[#allocation5 + $0x20] ss:$16 sps:$4 sm:$0xff]   ;;  %v1830_v28 = vld [vmem:[#allocation5 + $0x28] ss:$16 sps:$4 sm:$0xff]  }
  0x4a   :  { %v1831_v29 = vld [vmem:[#allocation5 + $0x4] ss:$16 sps:$4 sm:$0xff]   ;;  %v1833_v30 = vld [vmem:[#allocation5 + $0xc] ss:$16 sps:$4 sm:$0xff]   ;;  %v1835_v31 = vld [vmem:[#allocation5] ss:$16 sps:$4 sm:$0xff]  }
  0x4b   :  { %312 = vmatpush1.bf16.msra.mxu0 %v1805_v11  ;;  %353 = vmatpush1.bf16.msra.mxu1 %v1806_v12  ;;  %v1836_v32 = vld [vmem:[#allocation5 + $0x8] ss:$16 sps:$4 sm:$0xff]   ;;  %v1839_v33 = vld [vmem:[#allocation8 + $0xac] ss:$12 sps:$4 sm:$0xff]   ;;  %v1843_v40 = vld [vmem:[#allocation8 + $0x90] ss:$12 sps:$4 sm:$0xff]  }
  0x4c   :  { %313 = vmatprep.subr.bf16.mxu0 %v1807_v13  ;;  %354 = vmatprep.subr.bf16.mxu1 %v1809_v14  ;;  %v1842_v34 = vld [vmem:[#allocation8 + $0x22c] ss:$12 sps:$4 sm:$0xff]   ;;  %v1837_v36 = vld [vmem:[#allocation8 + $0xa8] ss:$12 sps:$4 sm:$0xff]   ;;  %v1846_v41 = vld [vmem:[#allocation8 + $0x210] ss:$12 sps:$4 sm:$0xff]  }
  0x4d   :  { %v92_v35 = vld [vmem:[#allocation2] sm:$0xf]  ;;  %v1840_v37 = vld [vmem:[#allocation8 + $0x228] ss:$12 sps:$4 sm:$0xff]   ;;  %v1857_v46 = vld [vmem:[#allocation8 + $0x64] ss:$12 sps:$4 sm:$0xff]  }
  0x4e   :  { %v1845_v38 = vld [vmem:[#allocation8 + $0x94] ss:$12 sps:$4 sm:$0xff]   ;;  %v1851_v42 = vld [vmem:[#allocation8 + $0x7c] ss:$12 sps:$4 sm:$0xff]   ;;  %v1849_v44 = vld [vmem:[#allocation8 + $0x78] ss:$12 sps:$4 sm:$0xff]  }
  0x4f   :  { %314 = vmatpush1.bf16.msra.mxu0 %v1811_v15  ;;  %355 = vmatpush1.bf16.msra.mxu1 %v1812_v16  ;;  %v1848_v39 = vld [vmem:[#allocation8 + $0x214] ss:$12 sps:$4 sm:$0xff]   ;;  %v1854_v43 = vld [vmem:[#allocation8 + $0x1fc] ss:$12 sps:$4 sm:$0xff]   ;;  %v1852_v45 = vld [vmem:[#allocation8 + $0x1f8] ss:$12 sps:$4 sm:$0xff]  }
  0x50   :  { %315 = vmatprep.subr.bf16.mxu0 %v1813_v17  ;;  %356 = vmatprep.subr.bf16.mxu1 %v1815_v18  ;;  %v1860_v47 = vld [vmem:[#allocation8 + $0x1e4] ss:$12 sps:$4 sm:$0xff]   ;;  %v1855_v48 = vld [vmem:[#allocation8 + $0x60] ss:$12 sps:$4 sm:$0xff]   ;;  %v1861_v52 = vld [vmem:[#allocation8 + $0x48] ss:$12 sps:$4 sm:$0xff]  }
  0x51   :  { %v1858_v49 = vld [vmem:[#allocation8 + $0x1e0] ss:$12 sps:$4 sm:$0xff]   ;;  %v1864_v53 = vld [vmem:[#allocation8 + $0x1c8] ss:$12 sps:$4 sm:$0xff]   ;;  %v1867_v56 = vld [vmem:[#allocation8 + $0x30] ss:$12 sps:$4 sm:$0xff]  }
  0x52   :  { %v1863_v50 = vld [vmem:[#allocation8 + $0x4c] ss:$12 sps:$4 sm:$0xff]   ;;  %v1869_v54 = vld [vmem:[#allocation8 + $0x34] ss:$12 sps:$4 sm:$0xff]   ;;  %v1870_v57 = vld [vmem:[#allocation8 + $0x1b0] ss:$12 sps:$4 sm:$0xff]  }
  0x53   :  { %316 = vmatpush1.bf16.msra.mxu0 %v1817_v19  ;;  %357 = vmatpush1.bf16.msra.mxu1 %v1818_v20  ;;  %v1866_v51 = vld [vmem:[#allocation8 + $0x1cc] ss:$12 sps:$4 sm:$0xff]   ;;  %v1872_v55 = vld [vmem:[#allocation8 + $0x1b4] ss:$12 sps:$4 sm:$0xff]   ;;  %v1875_v58 = vld [vmem:[#allocation8 + $0x1c] ss:$12 sps:$4 sm:$0xff]  }
  0x54   :  { %317 = vmatprep.subr.bf16.mxu0 %v1819_v21  ;;  %358 = vmatprep.subr.bf16.mxu1 %v1821_v22  ;;  %v1878_v59 = vld [vmem:[#allocation8 + $0x19c] ss:$12 sps:$4 sm:$0xff]   ;;  %v1873_v60 = vld [vmem:[#allocation8 + $0x18] ss:$12 sps:$4 sm:$0xff]   ;;  %v1879_v0 = vld [vmem:[#allocation8] ss:$12 sps:$4 sm:$0xff]  }
  0x55   :  { %v1876_v61 = vld [vmem:[#allocation8 + $0x198] ss:$12 sps:$4 sm:$0xff]   ;;  %v1882_v1 = vld [vmem:[#allocation8 + $0x180] ss:$12 sps:$4 sm:$0xff]   ;;  %v1885_v4 = vld [vmem:[#allocation8 + $0x168] ss:$12 sps:$4 sm:$0xff]  }
  0x56   :  { %v1881_v62 = vld [vmem:[#allocation8 + $0x4] ss:$12 sps:$4 sm:$0xff]   ;;  %v1887_v2 = vld [vmem:[#allocation8 + $0x16c] ss:$12 sps:$4 sm:$0xff]   ;;  %v1888_v5 = vld [vmem:[#allocation8 + $0x2e8] ss:$12 sps:$4 sm:$0xff]  }
  0x57   :  { %318 = vmatpush1.bf16.msra.mxu0 %v1823_v23  ;;  %359 = vmatpush1.bf16.msra.mxu1 %v1824_v24  ;;  %v1884_v63 = vld [vmem:[#allocation8 + $0x184] ss:$12 sps:$4 sm:$0xff]   ;;  %v1890_v3 = vld [vmem:[#allocation8 + $0x2ec] ss:$12 sps:$4 sm:$0xff]   ;;  %v1893_v6 = vld [vmem:[#allocation8 + $0x154] ss:$12 sps:$4 sm:$0xff]  }
  0x58   :  { %319 = vmatprep.subr.bf16.mxu0 %v1825_v25  ;;  %360 = vmatprep.subr.bf16.mxu1 %v1827_v26  ;;  %v1896_v7 = vld [vmem:[#allocation8 + $0x2d4] ss:$12 sps:$4 sm:$0xff]   ;;  %v1891_v8 = vld [vmem:[#allocation8 + $0x150] ss:$12 sps:$4 sm:$0xff]   ;;  %v1897_v12 = vld [vmem:[#allocation8 + $0x138] ss:$12 sps:$4 sm:$0xff]  }
  0x59   :  { %v1894_v9 = vld [vmem:[#allocation8 + $0x2d0] ss:$12 sps:$4 sm:$0xff]   ;;  %v1900_v13 = vld [vmem:[#allocation8 + $0x2b8] ss:$12 sps:$4 sm:$0xff]   ;;  %v1903_v16 = vld [vmem:[#allocation8 + $0x120] ss:$12 sps:$4 sm:$0xff]  }
  0x5a   :  { %v1899_v10 = vld [vmem:[#allocation8 + $0x13c] ss:$12 sps:$4 sm:$0xff]   ;;  %v1905_v14 = vld [vmem:[#allocation8 + $0x124] ss:$12 sps:$4 sm:$0xff]   ;;  %v1906_v17 = vld [vmem:[#allocation8 + $0x2a0] ss:$12 sps:$4 sm:$0xff]  }
  0x5b   :  { %320 = vmatpush1.bf16.msra.mxu0 %v1829_v27  ;;  %361 = vmatpush1.bf16.msra.mxu1 %v1830_v28  ;;  %v1902_v11 = vld [vmem:[#allocation8 + $0x2bc] ss:$12 sps:$4 sm:$0xff]   ;;  %v1908_v15 = vld [vmem:[#allocation8 + $0x2a4] ss:$12 sps:$4 sm:$0xff]   ;;  %v1911_v18 = vld [vmem:[#allocation8 + $0x10c] ss:$12 sps:$4 sm:$0xff]  }
  0x5c   :  { %321 = vmatprep.subr.bf16.mxu0 %v1831_v29  ;;  %362 = vmatprep.subr.bf16.mxu1 %v1833_v30  ;;  %v1914_v19 = vld [vmem:[#allocation8 + $0x28c] ss:$12 sps:$4 sm:$0xff]   ;;  %v1909_v20 = vld [vmem:[#allocation8 + $0x108] ss:$12 sps:$4 sm:$0xff]   ;;  %v1915_v24 = vld [vmem:[#allocation8 + $0xf0] ss:$12 sps:$4 sm:$0xff]  }
  0x5d   :  { %v1912_v21 = vld [vmem:[#allocation8 + $0x288] ss:$12 sps:$4 sm:$0xff]   ;;  %v1918_v25 = vld [vmem:[#allocation8 + $0x270] ss:$12 sps:$4 sm:$0xff]   ;;  %v1921_v28 = vld [vmem:[#allocation8 + $0xd8] ss:$12 sps:$4 sm:$0xff]  }
  0x5e   :  { %v1917_v22 = vld [vmem:[#allocation8 + $0xf4] ss:$12 sps:$4 sm:$0xff]   ;;  %v1923_v26 = vld [vmem:[#allocation8 + $0xdc] ss:$12 sps:$4 sm:$0xff]   ;;  %v1924_v29 = vld [vmem:[#allocation8 + $0x258] ss:$12 sps:$4 sm:$0xff]  }
  0x5f   :  { %322 = vmatpush1.bf16.msra.mxu0 %v1835_v31  ;;  %363 = vmatpush1.bf16.msra.mxu1 %v1836_v32  ;;  %v1920_v23 = vld [vmem:[#allocation8 + $0x274] ss:$12 sps:$4 sm:$0xff]   ;;  %v1926_v27 = vld [vmem:[#allocation8 + $0x25c] ss:$12 sps:$4 sm:$0xff]   ;;  %v1929_v30 = vld [vmem:[#allocation8 + $0xc4] ss:$12 sps:$4 sm:$0xff]  }
  0x60   :  { %1054 = vmatprep.subr.bf16.mxu0 %v1839_v33  ;;  %1095 = vmatprep.subr.bf16.mxu1 %v1842_v34  ;;  %v1932_v31 = vld [vmem:[#allocation8 + $0x244] ss:$12 sps:$4 sm:$0xff]   ;;  %v1927_v32 = vld [vmem:[#allocation8 + $0xc0] ss:$12 sps:$4 sm:$0xff]   ;;  %s2135_s30 = smov [#allocation11]  }
  0x61   :  { %v1930_v33 = vld [vmem:[#allocation8 + $0x240] ss:$12 sps:$4 sm:$0xff]   ;;  %v1933_v34 = vld [vmem:[#allocation8 + $0x170] ss:$12 sps:$4 sm:$0xff]   ;;  %s1514_s8 = sshll.u32 %s2135_s30, 4  ;;  %s1515_s8 = int_to_ptr.vmem [resolvable:$true] %s1514_s8 }
  0x62   :  { %340 = vmatmul.mubr.bf16.vlgmr.msra.gmra.mxu0 %v92_v35  ;;  %381 = vmatmul.mubr.bf16.vlgmr.msra.gmra.mxu1 %v92_v35  ;;  %v1934_v35 = vld [vmem:[#allocation8 + $0x2f0] ss:$12 sps:$4 sm:$0xff]   ;;  %s2093_s9 = scalar_lea.vmem %s1515_s8, 128  ;;  %p2098_p12 = scmp.lt.s32.totalorder %s1515_s8, %s1515_s8 }
  0x63   :  { %1055 = vmatpush1.bf16.msra.mxu0 %v1837_v36  ;;  %1096 = vmatpush1.bf16.msra.mxu1 %v1840_v37  ;;  %v127_v36 = vlaneseq  ;;  %p2094_p11 = scmp.ne.s32.totalorder %s1515_s8, %s2093_s9  ;;  %p2099_p13 = scmp.lt.s32.totalorder %s2093_s9, %s2093_s9 }
  0x64   :  { %1056 = vmatprep.subr.bf16.mxu0 %v1845_v38  ;;  %1097 = vmatprep.subr.bf16.mxu1 %v1848_v39 }
  0x65   :  { %v2191_v37 = vshrl.u32 %v127_v36, 7  ;;  %v1968_v36 = vld [vmem:[#allocation10 + $0x30] sm:$0xff]   ;;  %p2100_p0 = por %p2099_p13, %p2098_p12 }
  0x67   :  { %1057 = vmatpush1.bf16.msra.mxu0 %v1843_v40  ;;  %1098 = vmatpush1.bf16.msra.mxu1 %v1846_v41  ;;  %v129_v38 = vsub.s32 0, %v2191_v37  ;;  %v137_v39 = vsub.s32 2, %v2191_v37  ;;  %v125_v40 = vld [vmem:[#allocation7] sm:$0xf]  ;;  %v133_v41 = vsub.s32 1, %v2191_v37  ;;  %p2101_p1 = pnand %p2100_p0, %p2094_p11 }
  0x68   :  { %1058 = vmatprep.subr.bf16.mxu0 %v1851_v42  ;;  %1099 = vmatprep.subr.bf16.mxu1 %v1854_v43  ;;  %v141_v42 = vsub.s32 3, %v2191_v37  ;;  %v1653_v37 = vld [vmem:[%s2232_s6] ss:$0 sm:$0xff] }
  0x69   :  { %v130_v43 = vrot.slane %v125_v40, %v129_v38 }
  0x6b   :  { %1059 = vmatpush1.bf16.msra.mxu0 %v1849_v44  ;;  %1100 = vmatpush1.bf16.msra.mxu1 %v1852_v45  ;;  %v138_v44 = vrot.slane %v125_v40, %v137_v39  ;;  %v134_v45 = vrot.slane %v125_v40, %v133_v41 }
  0x6c   :  { %1060 = vmatprep.subr.bf16.mxu0 %v1857_v46  ;;  %1101 = vmatprep.subr.bf16.mxu1 %v1860_v47  ;;  %v142_v46 = vrot.slane %v125_v40, %v141_v42  ;;  %v1969_v40 = vld [vmem:[#allocation10 + $0x68] sm:$0xff]  }
  0x6d   :  { %v1970_v42 = vld [vmem:[#allocation10 + $0x28] sm:$0xff]  }
  0x6f   :  { %1061 = vmatpush1.bf16.msra.mxu0 %v1855_v48  ;;  %1102 = vmatpush1.bf16.msra.mxu1 %v1858_v49 }
  0x70   :  { %1062 = vmatprep.subr.bf16.mxu0 %v1863_v50  ;;  %1103 = vmatprep.subr.bf16.mxu1 %v1866_v51 }
  0x73   :  { %1063 = vmatpush1.bf16.msra.mxu0 %v1861_v52  ;;  %1104 = vmatpush1.bf16.msra.mxu1 %v1864_v53 }
  0x74   :  { %1064 = vmatprep.subr.bf16.mxu0 %v1869_v54  ;;  %1105 = vmatprep.subr.bf16.mxu1 %v1872_v55 }
  0x77   :  { %1065 = vmatpush1.bf16.msra.mxu0 %v1867_v56  ;;  %1106 = vmatpush1.bf16.msra.mxu1 %v1870_v57 }
  0x78   :  { %1066 = vmatprep.subr.bf16.mxu0 %v1875_v58  ;;  %1107 = vmatprep.subr.bf16.mxu1 %v1878_v59 }
  0x7b   :  { %1067 = vmatpush1.bf16.msra.mxu0 %v1873_v60  ;;  %1108 = vmatpush1.bf16.msra.mxu1 %v1876_v61 }
  0x7c   :  { %1068 = vmatprep.subr.bf16.mxu0 %v1881_v62  ;;  %1109 = vmatprep.subr.bf16.mxu1 %v1884_v63 }
  0x7f   :  { %1069 = vmatpush1.bf16.msra.mxu0 %v1879_v0  ;;  %1110 = vmatpush1.bf16.msra.mxu1 %v1882_v1 }
  0x80   :  { %1070 = vmatprep.subr.bf16.mxu0 %v1887_v2  ;;  %1111 = vmatprep.subr.bf16.mxu1 %v1890_v3  ;;  %v1935_v2 = vld [vmem:[#allocation8 + $0xb0] ss:$12 sps:$4 sm:$0xff]  }
  0x81   :  { %v1936_v3 = vld [vmem:[#allocation8 + $0x230] ss:$12 sps:$4 sm:$0xff]  }
  0x83   :  { %1071 = vmatpush2.bf16.msra.mxu0 %v1885_v4  ;;  %1112 = vmatpush2.bf16.msra.mxu1 %v1888_v5  ;;  %v1937_v5 = vld [vmem:[#allocation8 + $0x158] ss:$12 sps:$4 sm:$0xff]  }
  0x84   :  { %1072 = vmatprep.subr.bf16.mxu0 %v1893_v6  ;;  %1113 = vmatprep.subr.bf16.mxu1 %v1896_v7  ;;  %v1938_v6 = vld [vmem:[#allocation8 + $0x2d8] ss:$12 sps:$4 sm:$0xff]  }
  0x85   :  { %v1939_v7 = vld [vmem:[#allocation8 + $0x98] ss:$12 sps:$4 sm:$0xff]  }
  0x87   :  { %1073 = vmatpush2.bf16.msra.mxu0 %v1891_v8  ;;  %1114 = vmatpush2.bf16.msra.mxu1 %v1894_v9  ;;  %v1940_v8 = vld [vmem:[#allocation8 + $0x218] ss:$12 sps:$4 sm:$0xff]   ;;  %v1941_v9 = vld [vmem:[#allocation8 + $0x140] ss:$12 sps:$4 sm:$0xff]  }
  0x88   :  { %1074 = vmatprep.subr.bf16.mxu0 %v1899_v10  ;;  %1115 = vmatprep.subr.bf16.mxu1 %v1902_v11  ;;  %v1942_v10 = vld [vmem:[#allocation8 + $0x2c0] ss:$12 sps:$4 sm:$0xff]  }
  0x89   :  { %v1943_v11 = vld [vmem:[#allocation8 + $0x80] ss:$12 sps:$4 sm:$0xff]  }
  0x8b   :  { %1075 = vmatpush2.bf16.msra.mxu0 %v1897_v12  ;;  %1116 = vmatpush2.bf16.msra.mxu1 %v1900_v13  ;;  %v1944_v12 = vld [vmem:[#allocation8 + $0x200] ss:$12 sps:$4 sm:$0xff]   ;;  %v1945_v13 = vld [vmem:[#allocation8 + $0x128] ss:$12 sps:$4 sm:$0xff]  }
  0x8c   :  { %1076 = vmatprep.subr.bf16.mxu0 %v1905_v14  ;;  %1117 = vmatprep.subr.bf16.mxu1 %v1908_v15  ;;  %v1946_v14 = vld [vmem:[#allocation8 + $0x2a8] ss:$12 sps:$4 sm:$0xff]  }
  0x8d   :  { %v1947_v15 = vld [vmem:[#allocation8 + $0x68] ss:$12 sps:$4 sm:$0xff]  }
  0x8f   :  { %1077 = vmatpush2.bf16.msra.mxu0 %v1903_v16  ;;  %1118 = vmatpush2.bf16.msra.mxu1 %v1906_v17  ;;  %v1948_v16 = vld [vmem:[#allocation8 + $0x1e8] ss:$12 sps:$4 sm:$0xff]   ;;  %v1949_v17 = vld [vmem:[#allocation8 + $0x110] ss:$12 sps:$4 sm:$0xff]  }
  0x90   :  { %1078 = vmatprep.subr.bf16.mxu0 %v1911_v18  ;;  %1119 = vmatprep.subr.bf16.mxu1 %v1914_v19  ;;  %v1950_v18 = vld [vmem:[#allocation8 + $0x290] ss:$12 sps:$4 sm:$0xff]  }
  0x91   :  { %v1951_v19 = vld [vmem:[#allocation8 + $0x50] ss:$12 sps:$4 sm:$0xff]  }
  0x93   :  { %1079 = vmatpush2.bf16.msra.mxu0 %v1909_v20  ;;  %1120 = vmatpush2.bf16.msra.mxu1 %v1912_v21  ;;  %v1952_v20 = vld [vmem:[#allocation8 + $0x1d0] ss:$12 sps:$4 sm:$0xff]   ;;  %v1953_v21 = vld [vmem:[#allocation8 + $0xf8] ss:$12 sps:$4 sm:$0xff]  }
  0x94   :  { %1080 = vmatprep.subr.bf16.mxu0 %v1917_v22  ;;  %1121 = vmatprep.subr.bf16.mxu1 %v1920_v23  ;;  %v1954_v22 = vld [vmem:[#allocation8 + $0x278] ss:$12 sps:$4 sm:$0xff]  }
  0x95   :  { %v1955_v23 = vld [vmem:[#allocation8 + $0x38] ss:$12 sps:$4 sm:$0xff]  }
  0x97   :  { %1081 = vmatpush2.bf16.msra.mxu0 %v1915_v24  ;;  %1122 = vmatpush2.bf16.msra.mxu1 %v1918_v25  ;;  %v1956_v24 = vld [vmem:[#allocation8 + $0x1b8] ss:$12 sps:$4 sm:$0xff]   ;;  %v1957_v25 = vld [vmem:[#allocation8 + $0xe0] ss:$12 sps:$4 sm:$0xff]  }
  0x98   :  { %1082 = vmatprep.subr.bf16.mxu0 %v1923_v26  ;;  %1123 = vmatprep.subr.bf16.mxu1 %v1926_v27  ;;  %v1958_v26 = vld [vmem:[#allocation8 + $0x260] ss:$12 sps:$4 sm:$0xff]  }
  0x99   :  { %v1959_v27 = vld [vmem:[#allocation8 + $0x20] ss:$12 sps:$4 sm:$0xff]  }
  0x9b   :  { %1083 = vmatpush2.bf16.msra.mxu0 %v1921_v28  ;;  %1124 = vmatpush2.bf16.msra.mxu1 %v1924_v29  ;;  %v1960_v28 = vld [vmem:[#allocation8 + $0x1a0] ss:$12 sps:$4 sm:$0xff]   ;;  %v1961_v29 = vld [vmem:[#allocation8 + $0xc8] ss:$12 sps:$4 sm:$0xff]  }
  0x9c   :  { %1084 = vmatprep.subr.bf16.mxu0 %v1929_v30  ;;  %1125 = vmatprep.subr.bf16.mxu1 %v1932_v31  ;;  %v1962_v30 = vld [vmem:[#allocation8 + $0x248] ss:$12 sps:$4 sm:$0xff]  }
  0x9d   :  { %v1963_v31 = vld [vmem:[#allocation8 + $0x8] ss:$12 sps:$4 sm:$0xff]  }
  0x9f   :  { %1085 = vmatpush2.bf16.msra.mxu0 %v1927_v32  ;;  %1126 = vmatpush2.bf16.msra.mxu1 %v1930_v33  ;;  %v1964_v32 = vld [vmem:[#allocation8 + $0x188] ss:$12 sps:$4 sm:$0xff]   ;;  %v1965_v33 = vld [vmem:[#allocation10 + $0x78] sm:$0xff]  }
  0xa0   :  { %1679 = vmatprep.subr.bf16.mxu0 %v1933_v34  ;;  %1701 = vmatprep.subr.bf16.mxu1 %v1934_v35  ;;  %v1966_v34 = vld [vmem:[#allocation10 + $0x38] sm:$0xff]   ;;  %v1967_v35 = vld [vmem:[#allocation10 + $0x70] sm:$0xff]  }
 0x122   :  { %v341_v47 = vpop.f32.mrf.mxu0  ;;  %v382_v48 = vpop.f32.mrf.mxu1 }
 0x123   :  { %v342_v49 = vadd.f32 %v341_v47, %v130_v43  ;;  %v383_v50 = vadd.f32 %v382_v48, %v138_v44  ;;  %v1971_v43 = vld [vmem:[#allocation10 + $0x60] sm:$0xff]   ;;  %v1975_v47 = vld [vmem:[#allocation10 + $0x50] sm:$0xff]  }
 0x124   :  { %v343_v51 = vpop.f32.mrf.mxu0  ;;  %v384_v52 = vpop.f32.mrf.mxu1  ;;  %v1972_v44 = vld [vmem:[#allocation10 + $0x20] sm:$0xff]   ;;  %v1976_v48 = vld [vmem:[#allocation10 + $0x10] sm:$0xff]  }
 0x125   :  { %v391_v53 = vmax.f32 %v383_v50, 0.0  ;;  %v344_v54 = vadd.f32 %v343_v51, %v134_v45  ;;  %v385_v55 = vadd.f32 %v384_v52, %v142_v46  ;;  %v389_v56 = vmax.f32 %v342_v49, 0.0  ;;  %v1973_v45 = vld [vmem:[#allocation10 + $0x58] sm:$0xff]   ;;  %v1977_v49 = vld [vmem:[#allocation10 + $0x48] sm:$0xff]   ;;  %v1979_v51 = vld [vmem:[#allocation10 + $0x40] sm:$0xff]  }
 0x126   :  { %v345_v57 = vpop.f32.mrf.mxu0  ;;  %v386_v58 = vpop.f32.mrf.mxu1  ;;  %v1974_v46 = vld [vmem:[#allocation10 + $0x18] sm:$0xff]   ;;  %v1978_v50 = vld [vmem:[#allocation10 + $0x8] sm:$0xff]   ;;  %v1980_v52 = vld [vmem:[#allocation10] sm:$0xff]  }
 0x127   :  { %v390_v59 = vmax.f32 %v344_v54, 0.0  ;;  %v392_v60 = vmax.f32 %v385_v55, 0.0  ;;  %v2203_v61 = vpack.c.bf16 %v391_v53, %v391_v53  ;;  %v2205_v4 = vpack.c.bf16 %v389_v56, %v389_v56  ;;  %v1981_v53 = vld [vmem:[#allocation10 + $0xb8] sm:$0xff]   ;;  %v1982_v55 = vld [vmem:[#allocation10 + $0xb0] sm:$0xff]   ;;  %v1983_v56 = vld [vmem:[#allocation10 + $0xa8] sm:$0xff]  }
 0x128   :  { %v346_v62 = vpop.f32.mrf.mxu0  ;;  %v387_v63 = vpop.f32.mrf.mxu1  ;;  %v2133_v54 = vmov 0.0   ;;  %v1984_v57 = vld [vmem:[#allocation10 + $0xa0] sm:$0xff]   ;;  %v1985_v58 = vld [vmem:[#allocation10 + $0x98] sm:$0xff]  }
 0x129   :  { %v394_v0 = vpack.c.bf16 %v390_v59, %v390_v59  ;;  %v396_v1 = vpack.c.bf16 %v392_v60, %v392_v60  ;;  %v1986_v59 = vld [vmem:[#allocation10 + $0x90] sm:$0xff]   ;;  %v1987_v60 = vld [vmem:[#allocation10 + $0x88] sm:$0xff]   ;;  %v525_v62 = vld [vmem:[%s2230_s4] sm:$0x7] }
 0x12a   :  { %v530_v63 = vrot.slane %v525_v62, %v129_v38 }
 0x12b   :  { %1086 = vmatprep.mubr.bf16.mxu0 %v394_v0  ;;  %1127 = vmatprep.mubr.bf16.mxu1 %v396_v1 }
 0x12c   :  { %1087 = vmatmul.mubr.bf16.vlgmr.msra.gmra.mxu0 %v2205_v4  ;;  %1128 = vmatmul.mubr.bf16.vlgmr.msra.gmra.mxu1 %v2203_v61 }
 0x12d   :  { %1680 = vmatpush3.bf16.msra.mxu0 %v1935_v2  ;;  %1702 = vmatpush3.bf16.msra.mxu1 %v1936_v3 }
 0x12e   :  { %1168 = vmatprep.mubr.bf16.mxu0 %v394_v0  ;;  %1208 = vmatprep.mubr.bf16.mxu1 %v396_v1  ;;  %v534_v0 = vrot.slane %v525_v62, %v133_v41 }
 0x12f   :  { %1681 = vmatprep.subr.bf16.mxu0 %v1937_v5  ;;  %1703 = vmatprep.subr.bf16.mxu1 %v1938_v6 }
 0x131   :  { %1682 = vmatpush3.bf16.msra.mxu0 %v1939_v7  ;;  %1704 = vmatpush3.bf16.msra.mxu1 %v1940_v8 }
 0x132   :  { %1683 = vmatprep.subr.bf16.mxu0 %v1941_v9  ;;  %1705 = vmatprep.subr.bf16.mxu1 %v1942_v10 }
 0x135   :  { %1684 = vmatpush3.bf16.msra.mxu0 %v1943_v11  ;;  %1706 = vmatpush3.bf16.msra.mxu1 %v1944_v12 }
 0x136   :  { %1685 = vmatprep.subr.bf16.mxu0 %v1945_v13  ;;  %1707 = vmatprep.subr.bf16.mxu1 %v1946_v14 }
 0x139   :  { %1686 = vmatpush3.bf16.msra.mxu0 %v1947_v15  ;;  %1708 = vmatpush3.bf16.msra.mxu1 %v1948_v16 }
 0x13a   :  { %1687 = vmatprep.subr.bf16.mxu0 %v1949_v17  ;;  %1709 = vmatprep.subr.bf16.mxu1 %v1950_v18  ;;  %v538_v17 = vrot.slane %v525_v62, %v137_v39 }
 0x13d   :  { %1688 = vmatpush3.bf16.msra.mxu0 %v1951_v19  ;;  %1710 = vmatpush3.bf16.msra.mxu1 %v1952_v20 }
 0x13e   :  { %1689 = vmatprep.subr.bf16.mxu0 %v1953_v21  ;;  %1711 = vmatprep.subr.bf16.mxu1 %v1954_v22 }
 0x141   :  { %1690 = vmatpush3.bf16.msra.mxu0 %v1955_v23  ;;  %1712 = vmatpush3.bf16.msra.mxu1 %v1956_v24 }
 0x142   :  { %1691 = vmatprep.subr.bf16.mxu0 %v1957_v25  ;;  %1713 = vmatprep.subr.bf16.mxu1 %v1958_v26 }
 0x145   :  { %1692 = vmatpush3.bf16.msra.mxu0 %v1959_v27  ;;  %1714 = vmatpush3.bf16.msra.mxu1 %v1960_v28 }
 0x146   :  { %1693 = vmatprep.subr.bf16.mxu0 %v1961_v29  ;;  %1715 = vmatprep.subr.bf16.mxu1 %v1962_v30 }
 0x149   :  { %1694 = vmatpush3.bf16.msra.mxu0 %v1963_v31  ;;  %1716 = vmatpush3.bf16.msra.mxu1 %v1964_v32 }
 0x14a   :  { %1723 = vmatprep.subr.bf16.mxu0 %v1965_v33  ;;  %1754 = vmatprep.subr.bf16.mxu1 %v2133_v54 }
 0x14c   :  { %1169 = vmatmul.mubr.bf16.vlgmr.msra.gmra.mxu0 %v2205_v4  ;;  %1209 = vmatmul.mubr.bf16.vlgmr.msra.gmra.mxu1 %v2203_v61  ;;  %v1988_v61 = vld [vmem:[#allocation10 + $0x80] sm:$0xff]  }
 0x14d   :  { %1724 = vmatpush3.bf16.msra.mxu0 %v1966_v34  ;;  %1755 = vmatpush3.bf16.msra.mxu1 %v1981_v53 }
 0x14e   :  { %1725 = vmatprep.subr.bf16.mxu0 %v1967_v35  ;;  %1756 = vmatprep.subr.bf16.mxu1 %v2133_v54 }
 0x14f   :  { %1770 = vmatprep.mubr.msk.bf16.mxu1 %vm2134_vm0, %v2133_v54 }
 0x151   :  { %1726 = vmatpush3.bf16.msra.mxu0 %v1968_v36  ;;  %1757 = vmatpush3.bf16.msra.mxu1 %v1982_v55 }
 0x152   :  { %1727 = vmatprep.subr.bf16.mxu0 %v1969_v40  ;;  %1758 = vmatprep.subr.bf16.mxu1 %v2133_v54 }
 0x155   :  { %1728 = vmatpush3.bf16.msra.mxu0 %v1970_v42  ;;  %1759 = vmatpush3.bf16.msra.mxu1 %v1983_v56 }
 0x156   :  { %1729 = vmatprep.subr.bf16.mxu0 %v1971_v43  ;;  %1760 = vmatprep.subr.bf16.mxu1 %v2133_v54 }
 0x159   :  { %1730 = vmatpush3.bf16.msra.mxu0 %v1972_v44  ;;  %1761 = vmatpush3.bf16.msra.mxu1 %v1984_v57 }
 0x15a   :  { %1731 = vmatprep.subr.bf16.mxu0 %v1973_v45  ;;  %1762 = vmatprep.subr.bf16.mxu1 %v2133_v54 }
 0x15d   :  { %1732 = vmatpush3.bf16.msra.mxu0 %v1974_v46  ;;  %1763 = vmatpush3.bf16.msra.mxu1 %v1985_v58 }
 0x15e   :  { %1733 = vmatprep.subr.bf16.mxu0 %v1975_v47  ;;  %1764 = vmatprep.subr.bf16.mxu1 %v2133_v54 }
 0x161   :  { %1734 = vmatpush3.bf16.msra.mxu0 %v1976_v48  ;;  %1765 = vmatpush3.bf16.msra.mxu1 %v1986_v59 }
 0x162   :  { %1735 = vmatprep.subr.bf16.mxu0 %v1977_v49  ;;  %1766 = vmatprep.subr.bf16.mxu1 %v2133_v54 }
 0x165   :  { %1736 = vmatpush3.bf16.msra.mxu0 %v1978_v50  ;;  %1767 = vmatpush3.bf16.msra.mxu1 %v1987_v60 }
 0x166   :  { %1737 = vmatprep.subr.bf16.mxu0 %v1979_v51  ;;  %1768 = vmatprep.subr.bf16.mxu1 %v2133_v54 }
 0x169   :  { %1738 = vmatpush3.bf16.msra.mxu0 %v1980_v52  ;;  %1769 = vmatpush3.bf16.msra.mxu1 %v1988_v61 }
 0x1ec   :  { %v1088_v1 = vpop.f32.mrf.mxu0  ;;  %v1129_v2 = vpop.f32.mrf.mxu1 }
 0x1ed   :  { %v1089_v3 = vadd.f32 %v1088_v1, %v530_v63 }
 0x1ee   :  { %v1090_v4 = vpop.f32.mrf.mxu0  ;;  %v1131_v5 = vpop.f32.mrf.mxu1 }
 0x1ef   :  { %v1130_v6 = vadd.f32 %v1129_v2, %v1089_v3  ;;  %v1091_v7 = vadd.f32 %v1090_v4, %v534_v0 }
 0x1f0   :  { %v1092_v8 = vpop.f32.mrf.mxu0  ;;  %v1133_v9 = vpop.f32.mrf.mxu1 }
 0x1f1   :  { %v1132_v10 = vadd.f32 %v1131_v5, %v1091_v7  ;;  %v1216_v11 = vmax.f32 %v1130_v6, 0.0 }
 0x1f2   :  { %v1093_v12 = vpop.f32.mrf.mxu0  ;;  %v1134_v13 = vpop.f32.mrf.mxu1 }
 0x1f3   :  { %v1217_v14 = vmax.f32 %v1132_v10, 0.0  ;;  %v1219_v16 = vpack.c.bf16 %v1216_v11, %v1216_v11 }
 0x1f5   :  { %v1220_v15 = vpack.c.bf16 %v1217_v14, %v1217_v14 }
 0x1f7   :  { %1453 = vmatprep.mubr.bf16.mxu0 %v1220_v15 }
 0x1f8   :  { %1454 = vmatmul.mubr.bf16.vlgmr.msra.gmra.mxu0 %v1219_v16 }
 0x20c   :  { %v1695_v38 = vpop.f32.mrf.mxu0  ;;  %v1717_v41 = vpop.f32.mrf.mxu1 }
 0x20e   :  { %v1696_v18 = vpop.f32.mrf.mxu0  ;;  %v1718_v19 = vpop.f32.mrf.mxu1 }
 0x20f   :  { %v1697_v20 = vadd.f32 %v1696_v18, %v1695_v38  ;;  %v1719_v24 = vadd.f32 %v1718_v19, %v1717_v41 }
 0x210   :  { %v1698_v21 = vpop.f32.mrf.mxu0  ;;  %v1720_v22 = vpop.f32.mrf.mxu1 }
 0x211   :  { %v1171_v23 = vadd.f32 %v1697_v20, %v538_v17 }
 0x212   :  { %v1699_v25 = vpop.f32.mrf.mxu0  ;;  %v1721_v26 = vpop.f32.mrf.mxu1 }
 0x213   :  { %v1211_v27 = vadd.f32 %v1719_v24, %v1171_v23 }
 0x215   :  { %v1218_v28 = vmax.f32 %v1211_v27, 0.0 }
 0x217   :  { %v1221_v29 = vpack.c.bf16 %v1218_v28, %v1218_v28 }
 0x219   :  { %1771 = vmatmul.mubr.bf16.vlgmr.msra.gmra.mxu1 %v1221_v29 }
 0x2b8   :  { %v1739_v30 = vpop.f32.mrf.mxu0 }
 0x2ba   :  { %v1740_v31 = vpop.f32.mrf.mxu0 }
 0x2bb   :  { %v1741_v34 = vadd.f32 %v1740_v31, %v1739_v30 }
 0x2bc   :  { %v1742_v32 = vpop.f32.mrf.mxu0 }
 0x2bd   :  { %v1456_v39 = vadd.f32 %v1741_v34, %v1653_v37 }
 0x2be   :  { %v1743_v33 = vpop.f32.mrf.mxu0 }
 0x2d9   :  { %v1495_v35 = vpop.f32.mrf.mxu1 }
 0x2da   :  { %v1496_v36 = vadd.f32 %v1495_v35, %v1456_v39 }
 0x2db   :  { %v1772_v40 = vpop.f32.mrf.mxu1 }
 0x2dc   :  { %v1678_v42 = vmul.f32 -1.442695, %v1496_v36 }
 0x2dd   :  { %v1498_v43 = vpop.f32.mrf.mxu1 }
 0x2de   :  { %1989 = vpow2.f32 %v1678_v42 }
 0x2df   :  { %v1773_v44 = vpop.f32.mrf.mxu1 }
 0x2eb   :  { %v1990_v45 = vpop.eup %1989 }
 0x2ec   :  { %v1504_v46 = vadd.f32 1.0, %v1990_v45 }
 0x2ee   :  { %1991 = vrcp.f32 %v1504_v46 }
 0x2fb   :  { %v1992_v47 = vpop.eup %1991 }
 0x2fc   :  { %1507 = vst [vmem:[#allocation11] sm:$0xff] %v1992_v47 }
 0x2fd   :  { %2104 = shalt.err (!%p2101_p1)
}
 0x2fe   :  { %1517 = dma.vmem_to_hbm [thread:$0]  %s1515_s8, 128, %s2233_s7, [#allocation4]  }
 0x2ff   :  { %2119 = dma.done.wait [#allocation4], 128  }
 0x300   :  { %2120 = vsyncadd [#allocation4], 4294967168 }
 0x301   :  { %1521 = vsyncpa [#allocation3], 1 }
 0x302   :  { %1522 = vsyncpa [#allocation6], 1 }
 0x303   :  { %1523 = vsyncpa [#allocation9], 1 }
 0x304   :  { %1524 = vsyncpa [#allocation4], 1 }

// kernel: tpu_custom_call.1
= control target key start
LH: loop header
LB: loop body
LE: loop exit
PB: predicated region body
PF: predicated region fallthrough
CT: control target
= control target key end

     0   :  { %12 = vsyncpa [#allocation3], 0  ;;  %s2226_s0 = inlined_call_operand.hbm [shape: bf16[8,128], index: 0, kind: input, shape index: {}]   ;;  %s2227_s1 = inlined_call_operand.hbm [shape: bf16[128,512], index: 1, kind: input, shape index: {}]   ;;  %s2228_s2 = inlined_call_operand.hbm [shape: f32[1,512], index: 2, kind: input, shape index: {}]   ;;  %s2229_s3 = inlined_call_operand.hbm [shape: bf16[512,384], index: 3, kind: input, shape index: {}]   ;;  %s2230_s4 = inlined_call_operand.vmem [shape: f32[1,384], index: 4, kind: input, shape index: {}]   ;;  %s2231_s5 = inlined_call_operand.hbm [shape: bf16[384,128], index: 5, kind: input, shape index: {}]   ;;  %s2232_s6 = inlined_call_operand.vmem [shape: f32[1,128], index: 6, kind: input, shape index: {}]   ;;  %s2233_s7 = inlined_call_operand.hbm [shape: f32[8,128], index: 7, kind: output, shape index: {}]  }
   0x1   :  { %13 = vsyncpa [#allocation6], 0 }
   0x2   :  { %14 = vsyncpa [#allocation9], 0 }
   0x3   :  { %15 = vsyncpa [#allocation4], 0  ;;  %s2121_s24 = smov [#allocation5]  }
   0x4   :  { %s31_s25 = sshll.u32 %s2121_s24, 4  ;;  %s32_s25 = int_to_ptr.vmem [resolvable:$true] %s31_s25 }
   0x5   :  { %s2001_s26 = scalar_lea.vmem %s32_s25, 4096  ;;  %p2006_p1 = scmp.lt.s32.totalorder %s32_s25, %s32_s25 }
   0x6   :  { %p2002_p0 = scmp.ne.s32.totalorder %s32_s25, %s2001_s26  ;;  %p2007_p2 = scmp.lt.s32.totalorder %s2001_s26, %s2001_s26 }
   0x8   :  { %p2008_p3 = por %p2007_p2, %p2006_p1 }
   0xa   :  { %p2009_p4 = pnand %p2008_p3, %p2002_p0 }
   0xc   :  { %2012 = shalt.err (!%p2009_p4)
}
   0xd   :  { %s2122_s27 = smov 256   ;;  %s2123_s28 = smov 16  }
   0xe   :  { %37 = dma.hbm_to_vmem [thread:$0]  %s2227_s1, 4096, %s32_s25, [#allocation6], %s2122_s27, %s2122_s27, %s2123_s28  }
   0xf   :  { %s2124_s8 = smov [#allocation8]  }
  0x10   :  { %s53_s9 = sshll.u32 %s2124_s8, 4  ;;  %s54_s9 = int_to_ptr.vmem [resolvable:$true] %s53_s9 }
  0x11   :  { %s2021_s10 = scalar_lea.vmem %s54_s9, 12288  ;;  %p2026_p6 = scmp.lt.s32.totalorder %s54_s9, %s54_s9 }
  0x12   :  { %p2022_p5 = scmp.ne.s32.totalorder %s54_s9, %s2021_s10  ;;  %p2027_p7 = scmp.lt.s32.totalorder %s2021_s10, %s2021_s10 }
  0x14   :  { %p2028_p8 = por %p2027_p7, %p2026_p6 }
  0x16   :  { %p2029_p9 = pnand %p2028_p8, %p2022_p5 }
  0x18   :  { %2032 = shalt.err (!%p2029_p9)
}
  0x19   :  { %s2125_s11 = smov 192   ;;  %s2126_s12 = smov 12  }
  0x1a   :  { %59 = dma.hbm_to_vmem [thread:$0]  %s2229_s3, 12288, %s54_s9, [#allocation9], %s2125_s11, %s2125_s11, %s2126_s12  }
  0x1b   :  { %s2127_s15 = smov [#allocation2]   ;;  %s2128_s17 = smov [#allocation7]  }
  0x1c   :  { %s22_s16 = sshll.u32 %s2127_s15, 4  ;;  %s44_s1 = sshll.u32 %s2128_s17, 4  ;;  %s23_s16 = int_to_ptr.vmem [resolvable:$true] %s22_s16  ;;  %s45_s1 = int_to_ptr.vmem [resolvable:$true] %s44_s1 }
  0x1d   :  { %s2041_s18 = scalar_lea.vmem %s23_s16, 64  ;;  %p2046_p11 = scmp.lt.s32.totalorder %s23_s16, %s23_s16 }
  0x1e   :  { %p2042_p10 = scmp.ne.s32.totalorder %s23_s16, %s2041_s18  ;;  %p2047_p12 = scmp.lt.s32.totalorder %s2041_s18, %s2041_s18 }
  0x20   :  { %p2048_p13 = por %p2047_p12, %p2046_p11 }
  0x22   :  { %p2049_p0 = pnand %p2048_p13, %p2042_p10 }
  0x24   :  { %2052 = shalt.err (!%p2049_p0)
}
  0x25   :  { %25 = dma.hbm_to_vmem [thread:$0]  %s2226_s0, 64, %s23_s16, [#allocation3]  }
  0x26   :  { %s2061_s21 = scalar_lea.vmem %s45_s1, 64  ;;  %p2066_p2 = scmp.lt.s32.totalorder %s45_s1, %s45_s1 }
  0x27   :  { %p2062_p1 = scmp.ne.s32.totalorder %s45_s1, %s2061_s21  ;;  %p2067_p3 = scmp.lt.s32.totalorder %s2061_s21, %s2061_s21 }
  0x29   :  { %p2068_p4 = por %p2067_p3, %p2066_p2 }
  0x2b   :  { %p2069_p5 = pnand %p2068_p4, %p2062_p1 }
  0x2d   :  { %2072 = shalt.err (!%p2069_p5)
}
  0x2e   :  { %47 = dma.hbm_to_vmem [thread:$0]  %s2228_s2, 64, %s45_s1, [#allocation6]  }
  0x2f   :  { %s2129_s23 = smov [#allocation10]  }
  0x30   :  { %s67_s24 = sshll.u32 %s2129_s23, 4  ;;  %s68_s24 = int_to_ptr.vmem [resolvable:$true] %s67_s24 }
  0x31   :  { %s2081_s25 = scalar_lea.vmem %s68_s24, 3072  ;;  %p2086_p7 = scmp.lt.s32.totalorder %s68_s24, %s68_s24 }
  0x32   :  { %p2082_p6 = scmp.ne.s32.totalorder %s68_s24, %s2081_s25  ;;  %p2087_p8 = scmp.lt.s32.totalorder %s2081_s25, %s2081_s25 }
  0x34   :  { %p2088_p9 = por %p2087_p8, %p2086_p7 }
  0x36   :  { %p2089_p10 = pnand %p2088_p9, %p2082_p6 }
  0x38   :  { %2092 = shalt.err (!%p2089_p10)
}
  0x39   :  { %s2130_s0 = smov 64   ;;  %s2131_s26 = smov 4  }
  0x3a   :  { %73 = dma.hbm_to_vmem [thread:$0]  %s2231_s5, 3072, %s68_s24, [#allocation9], %s2130_s0, %s2130_s0, %s2131_s26  }
  0x3b   :  { %2113 = dma.done.wait [#allocation3], 64  }
  0x3c   :  { %2114 = vsyncadd [#allocation3], 4294967232 }
  0x3d   :  { %2115 = dma.done.wait [#allocation6], 4160  }
  0x3e   :  { %2116 = vsyncadd [#allocation6], 4294963136 }
  0x3f   :  { %2117 = dma.done.wait [#allocation9], 15360  }
  0x40   :  { %2118 = vsyncadd [#allocation9], 4294951936  ;;  %v2132_v0 = vmov 0   ;;  %v1789_v1 = vld [vmem:[#allocation5 + $0xe4] ss:$16 sps:$4 sm:$0xff]   ;;  %vm2134_vm0 = vmmov 0  }
  0x41   :  { %339 = vmatprep.mubr.bf16.mxu0 %v2132_v0  ;;  %380 = vmatprep.mubr.bf16.mxu1 %v2132_v0  ;;  %v1791_v2 = vld [vmem:[#allocation5 + $0xec] ss:$16 sps:$4 sm:$0xff]   ;;  %v1793_v3 = vld [vmem:[#allocation5 + $0xe0] ss:$16 sps:$4 sm:$0xff]   ;;  %v1794_v4 = vld [vmem:[#allocation5 + $0xe8] ss:$16 sps:$4 sm:$0xff]  }
  0x42   :  { %307 = vmatprep.subr.bf16.mxu0 %v1789_v1  ;;  %348 = vmatprep.subr.bf16.mxu1 %v1791_v2  ;;  %v1795_v5 = vld [vmem:[#allocation5 + $0xc4] ss:$16 sps:$4 sm:$0xff]   ;;  %v1797_v6 = vld [vmem:[#allocation5 + $0xcc] ss:$16 sps:$4 sm:$0xff]   ;;  %v1799_v7 = vld [vmem:[#allocation5 + $0xc0] ss:$16 sps:$4 sm:$0xff]  }
  0x43   :  { %308 = vmatpush1.bf16.msra.mxu0 %v1793_v3  ;;  %349 = vmatpush1.bf16.msra.mxu1 %v1794_v4  ;;  %v1800_v8 = vld [vmem:[#allocation5 + $0xc8] ss:$16 sps:$4 sm:$0xff]   ;;  %v1801_v9 = vld [vmem:[#allocation5 + $0xa4] ss:$16 sps:$4 sm:$0xff]   ;;  %v1803_v10 = vld [vmem:[#allocation5 + $0xac] ss:$16 sps:$4 sm:$0xff]  }
  0x44   :  { %309 = vmatprep.subr.bf16.mxu0 %v1795_v5  ;;  %350 = vmatprep.subr.bf16.mxu1 %v1797_v6  ;;  %v1805_v11 = vld [vmem:[#allocation5 + $0xa0] ss:$16 sps:$4 sm:$0xff]   ;;  %v1806_v12 = vld [vmem:[#allocation5 + $0xa8] ss:$16 sps:$4 sm:$0xff]   ;;  %v1807_v13 = vld [vmem:[#allocation5 + $0x84] ss:$16 sps:$4 sm:$0xff]  }
  0x45   :  { %v1809_v14 = vld [vmem:[#allocation5 + $0x8c] ss:$16 sps:$4 sm:$0xff]   ;;  %v1811_v15 = vld [vmem:[#allocation5 + $0x80] ss:$16 sps:$4 sm:$0xff]   ;;  %v1812_v16 = vld [vmem:[#allocation5 + $0x88] ss:$16 sps:$4 sm:$0xff]  }
  0x46   :  { %v1813_v17 = vld [vmem:[#allocation5 + $0x64] ss:$16 sps:$4 sm:$0xff]   ;;  %v1815_v18 = vld [vmem:[#allocation5 + $0x6c] ss:$16 sps:$4 sm:$0xff]   ;;  %v1817_v19 = vld [vmem:[#allocation5 + $0x60] ss:$16 sps:$4 sm:$0xff]  }
  0x47   :  { %310 = vmatpush1.bf16.msra.mxu0 %v1799_v7  ;;  %351 = vmatpush1.bf16.msra.mxu1 %v1800_v8  ;;  %v1818_v20 = vld [vmem:[#allocation5 + $0x68] ss:$16 sps:$4 sm:$0xff]   ;;  %v1819_v21 = vld [vmem:[#allocation5 + $0x44] ss:$16 sps:$4 sm:$0xff]   ;;  %v1821_v22 = vld [vmem:[#allocation5 + $0x4c] ss:$16 sps:$4 sm:$0xff]  }
  0x48   :  { %311 = vmatprep.subr.bf16.mxu0 %v1801_v9  ;;  %352 = vmatprep.subr.bf16.mxu1 %v1803_v10  ;;  %v1823_v23 = vld [vmem:[#allocation5 + $0x40] ss:$16 sps:$4 sm:$0xff]   ;;  %v1824_v24 = vld [vmem:[#allocation5 + $0x48] ss:$16 sps:$4 sm:$0xff]   ;;  %v1825_v25 = vld [vmem:[#allocation5 + $0x24] ss:$16 sps:$4 sm:$0xff]  }
  0x49   :  { %v1827_v26 = vld [vmem:[#allocation5 + $0x2c] ss:$16 sps:$4 sm:$0xff]   ;;  %v1829_v27 = vld [vmem:[#allocation5 + $0x20] ss:$16 sps:$4 sm:$0xff]   ;;  %v1830_v28 = vld [vmem:[#allocation5 + $0x28] ss:$16 sps:$4 sm:$0xff]  }
  0x4a   :  { %v1831_v29 = vld [vmem:[#allocation5 + $0x4] ss:$16 sps:$4 sm:$0xff]   ;;  %v1833_v30 = vld [vmem:[#allocation5 + $0xc] ss:$16 sps:$4 sm:$0xff]   ;;  %v1835_v31 = vld [vmem:[#allocation5] ss:$16 sps:$4 sm:$0xff]  }
  0x4b   :  { %312 = vmatpush1.bf16.msra.mxu0 %v1805_v11  ;;  %353 = vmatpush1.bf16.msra.mxu1 %v1806_v12  ;;  %v1836_v32 = vld [vmem:[#allocation5 + $0x8] ss:$16 sps:$4 sm:$0xff]   ;;  %v1839_v33 = vld [vmem:[#allocation8 + $0xac] ss:$12 sps:$4 sm:$0xff]   ;;  %v1843_v40 = vld [vmem:[#allocation8 + $0x90] ss:$12 sps:$4 sm:$0xff]  }
  0x4c   :  { %313 = vmatprep.subr.bf16.mxu0 %v1807_v13  ;;  %354 = vmatprep.subr.bf16.mxu1 %v1809_v14  ;;  %v1842_v34 = vld [vmem:[#allocation8 + $0x22c] ss:$12 sps:$4 sm:$0xff]   ;;  %v1837_v36 = vld [vmem:[#allocation8 + $0xa8] ss:$12 sps:$4 sm:$0xff]   ;;  %v1846_v41 = vld [vmem:[#allocation8 + $0x210] ss:$12 sps:$4 sm:$0xff]  }
  0x4d   :  { %v92_v35 = vld [vmem:[#allocation2] sm:$0xf]  ;;  %v1840_v37 = vld [vmem:[#allocation8 + $0x228] ss:$12 sps:$4 sm:$0xff]   ;;  %v1857_v46 = vld [vmem:[#allocation8 + $0x64] ss:$12 sps:$4 sm:$0xff]  }
  0x4e   :  { %v1845_v38 = vld [vmem:[#allocation8 + $0x94] ss:$12 sps:$4 sm:$0xff]   ;;  %v1851_v42 = vld [vmem:[#allocation8 + $0x7c] ss:$12 sps:$4 sm:$0xff]   ;;  %v1849_v44 = vld [vmem:[#allocation8 + $0x78] ss:$12 sps:$4 sm:$0xff]  }
  0x4f   :  { %314 = vmatpush1.bf16.msra.mxu0 %v1811_v15  ;;  %355 = vmatpush1.bf16.msra.mxu1 %v1812_v16  ;;  %v1848_v39 = vld [vmem:[#allocation8 + $0x214] ss:$12 sps:$4 sm:$0xff]   ;;  %v1854_v43 = vld [vmem:[#allocation8 + $0x1fc] ss:$12 sps:$4 sm:$0xff]   ;;  %v1852_v45 = vld [vmem:[#allocation8 + $0x1f8] ss:$12 sps:$4 sm:$0xff]  }
  0x50   :  { %315 = vmatprep.subr.bf16.mxu0 %v1813_v17  ;;  %356 = vmatprep.subr.bf16.mxu1 %v1815_v18  ;;  %v1860_v47 = vld [vmem:[#allocation8 + $0x1e4] ss:$12 sps:$4 sm:$0xff]   ;;  %v1855_v48 = vld [vmem:[#allocation8 + $0x60] ss:$12 sps:$4 sm:$0xff]   ;;  %v1861_v52 = vld [vmem:[#allocation8 + $0x48] ss:$12 sps:$4 sm:$0xff]  }
  0x51   :  { %v1858_v49 = vld [vmem:[#allocation8 + $0x1e0] ss:$12 sps:$4 sm:$0xff]   ;;  %v1864_v53 = vld [vmem:[#allocation8 + $0x1c8] ss:$12 sps:$4 sm:$0xff]   ;;  %v1867_v56 = vld [vmem:[#allocation8 + $0x30] ss:$12 sps:$4 sm:$0xff]  }
  0x52   :  { %v1863_v50 = vld [vmem:[#allocation8 + $0x4c] ss:$12 sps:$4 sm:$0xff]   ;;  %v1869_v54 = vld [vmem:[#allocation8 + $0x34] ss:$12 sps:$4 sm:$0xff]   ;;  %v1870_v57 = vld [vmem:[#allocation8 + $0x1b0] ss:$12 sps:$4 sm:$0xff]  }
  0x53   :  { %316 = vmatpush1.bf16.msra.mxu0 %v1817_v19  ;;  %357 = vmatpush1.bf16.msra.mxu1 %v1818_v20  ;;  %v1866_v51 = vld [vmem:[#allocation8 + $0x1cc] ss:$12 sps:$4 sm:$0xff]   ;;  %v1872_v55 = vld [vmem:[#allocation8 + $0x1b4] ss:$12 sps:$4 sm:$0xff]   ;;  %v1875_v58 = vld [vmem:[#allocation8 + $0x1c] ss:$12 sps:$4 sm:$0xff]  }
  0x54   :  { %317 = vmatprep.subr.bf16.mxu0 %v1819_v21  ;;  %358 = vmatprep.subr.bf16.mxu1 %v1821_v22  ;;  %v1878_v59 = vld [vmem:[#allocation8 + $0x19c] ss:$12 sps:$4 sm:$0xff]   ;;  %v1873_v60 = vld [vmem:[#allocation8 + $0x18] ss:$12 sps:$4 sm:$0xff]   ;;  %v1879_v0 = vld [vmem:[#allocation8] ss:$12 sps:$4 sm:$0xff]  }
  0x55   :  { %v1876_v61 = vld [vmem:[#allocation8 + $0x198] ss:$12 sps:$4 sm:$0xff]   ;;  %v1882_v1 = vld [vmem:[#allocation8 + $0x180] ss:$12 sps:$4 sm:$0xff]   ;;  %v1885_v4 = vld [vmem:[#allocation8 + $0x168] ss:$12 sps:$4 sm:$0xff]  }
  0x56   :  { %v1881_v62 = vld [vmem:[#allocation8 + $0x4] ss:$12 sps:$4 sm:$0xff]   ;;  %v1887_v2 = vld [vmem:[#allocation8 + $0x16c] ss:$12 sps:$4 sm:$0xff]   ;;  %v1888_v5 = vld [vmem:[#allocation8 + $0x2e8] ss:$12 sps:$4 sm:$0xff]  }
  0x57   :  { %318 = vmatpush1.bf16.msra.mxu0 %v1823_v23  ;;  %359 = vmatpush1.bf16.msra.mxu1 %v1824_v24  ;;  %v1884_v63 = vld [vmem:[#allocation8 + $0x184] ss:$12 sps:$4 sm:$0xff]   ;;  %v1890_v3 = vld [vmem:[#allocation8 + $0x2ec] ss:$12 sps:$4 sm:$0xff]   ;;  %v1893_v6 = vld [vmem:[#allocation8 + $0x154] ss:$12 sps:$4 sm:$0xff]  }
  0x58   :  { %319 = vmatprep.subr.bf16.mxu0 %v1825_v25  ;;  %360 = vmatprep.subr.bf16.mxu1 %v1827_v26  ;;  %v1896_v7 = vld [vmem:[#allocation8 + $0x2d4] ss:$12 sps:$4 sm:$0xff]   ;;  %v1891_v8 = vld [vmem:[#allocation8 + $0x150] ss:$12 sps:$4 sm:$0xff]   ;;  %v1897_v12 = vld [vmem:[#allocation8 + $0x138] ss:$12 sps:$4 sm:$0xff]  }
  0x59   :  { %v1894_v9 = vld [vmem:[#allocation8 + $0x2d0] ss:$12 sps:$4 sm:$0xff]   ;;  %v1900_v13 = vld [vmem:[#allocation8 + $0x2b8] ss:$12 sps:$4 sm:$0xff]   ;;  %v1903_v16 = vld [vmem:[#allocation8 + $0x120] ss:$12 sps:$4 sm:$0xff]  }
  0x5a   :  { %v1899_v10 = vld [vmem:[#allocation8 + $0x13c] ss:$12 sps:$4 sm:$0xff]   ;;  %v1905_v14 = vld [vmem:[#allocation8 + $0x124] ss:$12 sps:$4 sm:$0xff]   ;;  %v1906_v17 = vld [vmem:[#allocation8 + $0x2a0] ss:$12 sps:$4 sm:$0xff]  }
  0x5b   :  { %320 = vmatpush1.bf16.msra.mxu0 %v1829_v27  ;;  %361 = vmatpush1.bf16.msra.mxu1 %v1830_v28  ;;  %v1902_v11 = vld [vmem:[#allocation8 + $0x2bc] ss:$12 sps:$4 sm:$0xff]   ;;  %v1908_v15 = vld [vmem:[#allocation8 + $0x2a4] ss:$12 sps:$4 sm:$0xff]   ;;  %v1911_v18 = vld [vmem:[#allocation8 + $0x10c] ss:$12 sps:$4 sm:$0xff]  }
  0x5c   :  { %321 = vmatprep.subr.bf16.mxu0 %v1831_v29  ;;  %362 = vmatprep.subr.bf16.mxu1 %v1833_v30  ;;  %v1914_v19 = vld [vmem:[#allocation8 + $0x28c] ss:$12 sps:$4 sm:$0xff]   ;;  %v1909_v20 = vld [vmem:[#allocation8 + $0x108] ss:$12 sps:$4 sm:$0xff]   ;;  %v1915_v24 = vld [vmem:[#allocation8 + $0xf0] ss:$12 sps:$4 sm:$0xff]  }
  0x5d   :  { %v1912_v21 = vld [vmem:[#allocation8 + $0x288] ss:$12 sps:$4 sm:$0xff]   ;;  %v1918_v25 = vld [vmem:[#allocation8 + $0x270] ss:$12 sps:$4 sm:$0xff]   ;;  %v1921_v28 = vld [vmem:[#allocation8 + $0xd8] ss:$12 sps:$4 sm:$0xff]  }
  0x5e   :  { %v1917_v22 = vld [vmem:[#allocation8 + $0xf4] ss:$12 sps:$4 sm:$0xff]   ;;  %v1923_v26 = vld [vmem:[#allocation8 + $0xdc] ss:$12 sps:$4 sm:$0xff]   ;;  %v1924_v29 = vld [vmem:[#allocation8 + $0x258] ss:$12 sps:$4 sm:$0xff]  }
  0x5f   :  { %322 = vmatpush1.bf16.msra.mxu0 %v1835_v31  ;;  %363 = vmatpush1.bf16.msra.mxu1 %v1836_v32  ;;  %v1920_v23 = vld [vmem:[#allocation8 + $0x274] ss:$12 sps:$4 sm:$0xff]   ;;  %v1926_v27 = vld [vmem:[#allocation8 + $0x25c] ss:$12 sps:$4 sm:$0xff]   ;;  %v1929_v30 = vld [vmem:[#allocation8 + $0xc4] ss:$12 sps:$4 sm:$0xff]  }
  0x60   :  { %1054 = vmatprep.subr.bf16.mxu0 %v1839_v33  ;;  %1095 = vmatprep.subr.bf16.mxu1 %v1842_v34  ;;  %v1932_v31 = vld [vmem:[#allocation8 + $0x244] ss:$12 sps:$4 sm:$0xff]   ;;  %v1927_v32 = vld [vmem:[#allocation8 + $0xc0] ss:$12 sps:$4 sm:$0xff]   ;;  %s2135_s30 = smov [#allocation11]  }
  0x61   :  { %v1930_v33 = vld [vmem:[#allocation8 + $0x240] ss:$12 sps:$4 sm:$0xff]   ;;  %v1933_v34 = vld [vmem:[#allocation8 + $0x170] ss:$12 sps:$4 sm:$0xff]   ;;  %s1514_s8 = sshll.u32 %s2135_s30, 4  ;;  %s1515_s8 = int_to_ptr.vmem [resolvable:$true] %s1514_s8 }
  0x62   :  { %340 = vmatmul.mubr.bf16.vlgmr.msra.gmra.mxu0 %v92_v35  ;;  %381 = vmatmul.mubr.bf16.vlgmr.msra.gmra.mxu1 %v92_v35  ;;  %v1934_v35 = vld [vmem:[#allocation8 + $0x2f0] ss:$12 sps:$4 sm:$0xff]   ;;  %s2093_s9 = scalar_lea.vmem %s1515_s8, 128  ;;  %p2098_p12 = scmp.lt.s32.totalorder %s1515_s8, %s1515_s8 }
  0x63   :  { %1055 = vmatpush1.bf16.msra.mxu0 %v1837_v36  ;;  %1096 = vmatpush1.bf16.msra.mxu1 %v1840_v37  ;;  %v127_v36 = vlaneseq  ;;  %p2094_p11 = scmp.ne.s32.totalorder %s1515_s8, %s2093_s9  ;;  %p2099_p13 = scmp.lt.s32.totalorder %s2093_s9, %s2093_s9 }
  0x64   :  { %1056 = vmatprep.subr.bf16.mxu0 %v1845_v38  ;;  %1097 = vmatprep.subr.bf16.mxu1 %v1848_v39 }
  0x65   :  { %v2191_v37 = vshrl.u32 %v127_v36, 7  ;;  %v1968_v36 = vld [vmem:[#allocation10 + $0x30] sm:$0xff]   ;;  %p2100_p0 = por %p2099_p13, %p2098_p12 }
  0x67   :  { %1057 = vmatpush1.bf16.msra.mxu0 %v1843_v40  ;;  %1098 = vmatpush1.bf16.msra.mxu1 %v1846_v41  ;;  %v129_v38 = vsub.s32 0, %v2191_v37  ;;  %v137_v39 = vsub.s32 2, %v2191_v37  ;;  %v125_v40 = vld [vmem:[#allocation7] sm:$0xf]  ;;  %v133_v41 = vsub.s32 1, %v2191_v37  ;;  %p2101_p1 = pnand %p2100_p0, %p2094_p11 }
  0x68   :  { %1058 = vmatprep.subr.bf16.mxu0 %v1851_v42  ;;  %1099 = vmatprep.subr.bf16.mxu1 %v1854_v43  ;;  %v141_v42 = vsub.s32 3, %v2191_v37  ;;  %v1653_v37 = vld [vmem:[%s2232_s6] ss:$0 sm:$0xff] }
  0x69   :  { %v130_v43 = vrot.slane %v125_v40, %v129_v38 }
  0x6b   :  { %1059 = vmatpush1.bf16.msra.mxu0 %v1849_v44  ;;  %1100 = vmatpush1.bf16.msra.mxu1 %v1852_v45  ;;  %v138_v44 = vrot.slane %v125_v40, %v137_v39  ;;  %v134_v45 = vrot.slane %v125_v40, %v133_v41 }
  0x6c   :  { %1060 = vmatprep.subr.bf16.mxu0 %v1857_v46  ;;  %1101 = vmatprep.subr.bf16.mxu1 %v1860_v47  ;;  %v142_v46 = vrot.slane %v125_v40, %v141_v42  ;;  %v1969_v40 = vld [vmem:[#allocation10 + $0x68] sm:$0xff]  }
  0x6d   :  { %v1970_v42 = vld [vmem:[#allocation10 + $0x28] sm:$0xff]  }
  0x6f   :  { %1061 = vmatpush1.bf16.msra.mxu0 %v1855_v48  ;;  %1102 = vmatpush1.bf16.msra.mxu1 %v1858_v49 }
  0x70   :  { %1062 = vmatprep.subr.bf16.mxu0 %v1863_v50  ;;  %1103 = vmatprep.subr.bf16.mxu1 %v1866_v51 }
  0x73   :  { %1063 = vmatpush1.bf16.msra.mxu0 %v1861_v52  ;;  %1104 = vmatpush1.bf16.msra.mxu1 %v1864_v53 }
  0x74   :  { %1064 = vmatprep.subr.bf16.mxu0 %v1869_v54  ;;  %1105 = vmatprep.subr.bf16.mxu1 %v1872_v55 }
  0x77   :  { %1065 = vmatpush1.bf16.msra.mxu0 %v1867_v56  ;;  %1106 = vmatpush1.bf16.msra.mxu1 %v1870_v57 }
  0x78   :  { %1066 = vmatprep.subr.bf16.mxu0 %v1875_v58  ;;  %1107 = vmatprep.subr.bf16.mxu1 %v1878_v59 }
  0x7b   :  { %1067 = vmatpush1.bf16.msra.mxu0 %v1873_v60  ;;  %1108 = vmatpush1.bf16.msra.mxu1 %v1876_v61 }
  0x7c   :  { %1068 = vmatprep.subr.bf16.mxu0 %v1881_v62  ;;  %1109 = vmatprep.subr.bf16.mxu1 %v1884_v63 }
  0x7f   :  { %1069 = vmatpush1.bf16.msra.mxu0 %v1879_v0  ;;  %1110 = vmatpush1.bf16.msra.mxu1 %v1882_v1 }
  0x80   :  { %1070 = vmatprep.subr.bf16.mxu0 %v1887_v2  ;;  %1111 = vmatprep.subr.bf16.mxu1 %v1890_v3  ;;  %v1935_v2 = vld [vmem:[#allocation8 + $0xb0] ss:$12 sps:$4 sm:$0xff]  }
  0x81   :  { %v1936_v3 = vld [vmem:[#allocation8 + $0x230] ss:$12 sps:$4 sm:$0xff]  }
  0x83   :  { %1071 = vmatpush2.bf16.msra.mxu0 %v1885_v4  ;;  %1112 = vmatpush2.bf16.msra.mxu1 %v1888_v5  ;;  %v1937_v5 = vld [vmem:[#allocation8 + $0x158] ss:$12 sps:$4 sm:$0xff]  }
  0x84   :  { %1072 = vmatprep.subr.bf16.mxu0 %v1893_v6  ;;  %1113 = vmatprep.subr.bf16.mxu1 %v1896_v7  ;;  %v1938_v6 = vld [vmem:[#allocation8 + $0x2d8] ss:$12 sps:$4 sm:$0xff]  }
  0x85   :  { %v1939_v7 = vld [vmem:[#allocation8 + $0x98] ss:$12 sps:$4 sm:$0xff]  }
  0x87   :  { %1073 = vmatpush2.bf16.msra.mxu0 %v1891_v8  ;;  %1114 = vmatpush2.bf16.msra.mxu1 %v1894_v9  ;;  %v1940_v8 = vld [vmem:[#allocation8 + $0x218] ss:$12 sps:$4 sm:$0xff]   ;;  %v1941_v9 = vld [vmem:[#allocation8 + $0x140] ss:$12 sps:$4 sm:$0xff]  }
  0x88   :  { %1074 = vmatprep.subr.bf16.mxu0 %v1899_v10  ;;  %1115 = vmatprep.subr.bf16.mxu1 %v1902_v11  ;;  %v1942_v10 = vld [vmem:[#allocation8 + $0x2c0] ss:$12 sps:$4 sm:$0xff]  }
  0x89   :  { %v1943_v11 = vld [vmem:[#allocation8 + $0x80] ss:$12 sps:$4 sm:$0xff]  }
  0x8b   :  { %1075 = vmatpush2.bf16.msra.mxu0 %v1897_v12  ;;  %1116 = vmatpush2.bf16.msra.mxu1 %v1900_v13  ;;  %v1944_v12 = vld [vmem:[#allocation8 + $0x200] ss:$12 sps:$4 sm:$0xff]   ;;  %v1945_v13 = vld [vmem:[#allocation8 + $0x128] ss:$12 sps:$4 sm:$0xff]  }
  0x8c   :  { %1076 = vmatprep.subr.bf16.mxu0 %v1905_v14  ;;  %1117 = vmatprep.subr.bf16.mxu1 %v1908_v15  ;;  %v1946_v14 = vld [vmem:[#allocation8 + $0x2a8] ss:$12 sps:$4 sm:$0xff]  }
  0x8d   :  { %v1947_v15 = vld [vmem:[#allocation8 + $0x68] ss:$12 sps:$4 sm:$0xff]  }
  0x8f   :  { %1077 = vmatpush2.bf16.msra.mxu0 %v1903_v16  ;;  %1118 = vmatpush2.bf16.msra.mxu1 %v1906_v17  ;;  %v1948_v16 = vld [vmem:[#allocation8 + $0x1e8] ss:$12 sps:$4 sm:$0xff]   ;;  %v1949_v17 = vld [vmem:[#allocation8 + $0x110] ss:$12 sps:$4 sm:$0xff]  }
  0x90   :  { %1078 = vmatprep.subr.bf16.mxu0 %v1911_v18  ;;  %1119 = vmatprep.subr.bf16.mxu1 %v1914_v19  ;;  %v1950_v18 = vld [vmem:[#allocation8 + $0x290] ss:$12 sps:$4 sm:$0xff]  }
  0x91   :  { %v1951_v19 = vld [vmem:[#allocation8 + $0x50] ss:$12 sps:$4 sm:$0xff]  }
  0x93   :  { %1079 = vmatpush2.bf16.msra.mxu0 %v1909_v20  ;;  %1120 = vmatpush2.bf16.msra.mxu1 %v1912_v21  ;;  %v1952_v20 = vld [vmem:[#allocation8 + $0x1d0] ss:$12 sps:$4 sm:$0xff]   ;;  %v1953_v21 = vld [vmem:[#allocation8 + $0xf8] ss:$12 sps:$4 sm:$0xff]  }
  0x94   :  { %1080 = vmatprep.subr.bf16.mxu0 %v1917_v22  ;;  %1121 = vmatprep.subr.bf16.mxu1 %v1920_v23  ;;  %v1954_v22 = vld [vmem:[#allocation8 + $0x278] ss:$12 sps:$4 sm:$0xff]  }
  0x95   :  { %v1955_v23 = vld [vmem:[#allocation8 + $0x38] ss:$12 sps:$4 sm:$0xff]  }
  0x97   :  { %1081 = vmatpush2.bf16.msra.mxu0 %v1915_v24  ;;  %1122 = vmatpush2.bf16.msra.mxu1 %v1918_v25  ;;  %v1956_v24 = vld [vmem:[#allocation8 + $0x1b8] ss:$12 sps:$4 sm:$0xff]   ;;  %v1957_v25 = vld [vmem:[#allocation8 + $0xe0] ss:$12 sps:$4 sm:$0xff]  }
  0x98   :  { %1082 = vmatprep.subr.bf16.mxu0 %v1923_v26  ;;  %1123 = vmatprep.subr.bf16.mxu1 %v1926_v27  ;;  %v1958_v26 = vld [vmem:[#allocation8 + $0x260] ss:$12 sps:$4 sm:$0xff]  }
  0x99   :  { %v1959_v27 = vld [vmem:[#allocation8 + $0x20] ss:$12 sps:$4 sm:$0xff]  }
  0x9b   :  { %1083 = vmatpush2.bf16.msra.mxu0 %v1921_v28  ;;  %1124 = vmatpush2.bf16.msra.mxu1 %v1924_v29  ;;  %v1960_v28 = vld [vmem:[#allocation8 + $0x1a0] ss:$12 sps:$4 sm:$0xff]   ;;  %v1961_v29 = vld [vmem:[#allocation8 + $0xc8] ss:$12 sps:$4 sm:$0xff]  }
  0x9c   :  { %1084 = vmatprep.subr.bf16.mxu0 %v1929_v30  ;;  %1125 = vmatprep.subr.bf16.mxu1 %v1932_v31  ;;  %v1962_v30 = vld [vmem:[#allocation8 + $0x248] ss:$12 sps:$4 sm:$0xff]  }
  0x9d   :  { %v1963_v31 = vld [vmem:[#allocation8 + $0x8] ss:$12 sps:$4 sm:$0xff]  }
  0x9f   :  { %1085 = vmatpush2.bf16.msra.mxu0 %v1927_v32  ;;  %1126 = vmatpush2.bf16.msra.mxu1 %v1930_v33  ;;  %v1964_v32 = vld [vmem:[#allocation8 + $0x188] ss:$12 sps:$4 sm:$0xff]   ;;  %v1965_v33 = vld [vmem:[#allocation10 + $0x78] sm:$0xff]  }
  0xa0   :  { %1679 = vmatprep.subr.bf16.mxu0 %v1933_v34  ;;  %1701 = vmatprep.subr.bf16.mxu1 %v1934_v35  ;;  %v1966_v34 = vld [vmem:[#allocation10 + $0x38] sm:$0xff]   ;;  %v1967_v35 = vld [vmem:[#allocation10 + $0x70] sm:$0xff]  }
 0x122   :  { %v341_v47 = vpop.f32.mrf.mxu0  ;;  %v382_v48 = vpop.f32.mrf.mxu1 }
 0x123   :  { %v342_v49 = vadd.f32 %v341_v47, %v130_v43  ;;  %v383_v50 = vadd.f32 %v382_v48, %v138_v44  ;;  %v1971_v43 = vld [vmem:[#allocation10 + $0x60] sm:$0xff]   ;;  %v1975_v47 = vld [vmem:[#allocation10 + $0x50] sm:$0xff]  }
 0x124   :  { %v343_v51 = vpop.f32.mrf.mxu0  ;;  %v384_v52 = vpop.f32.mrf.mxu1  ;;  %v1972_v44 = vld [vmem:[#allocation10 + $0x20] sm:$0xff]   ;;  %v1976_v48 = vld [vmem:[#allocation10 + $0x10] sm:$0xff]  }
 0x125   :  { %v391_v53 = vmax.f32 %v383_v50, 0.0  ;;  %v344_v54 = vadd.f32 %v343_v51, %v134_v45  ;;  %v385_v55 = vadd.f32 %v384_v52, %v142_v46  ;;  %v389_v56 = vmax.f32 %v342_v49, 0.0  ;;  %v1973_v45 = vld [vmem:[#allocation10 + $0x58] sm:$0xff]   ;;  %v1977_v49 = vld [vmem:[#allocation10 + $0x48] sm:$0xff]   ;;  %v1979_v51 = vld [vmem:[#allocation10 + $0x40] sm:$0xff]  }
 0x126   :  { %v345_v57 = vpop.f32.mrf.mxu0  ;;  %v386_v58 = vpop.f32.mrf.mxu1  ;;  %v1974_v46 = vld [vmem:[#allocation10 + $0x18] sm:$0xff]   ;;  %v1978_v50 = vld [vmem:[#allocation10 + $0x8] sm:$0xff]   ;;  %v1980_v52 = vld [vmem:[#allocation10] sm:$0xff]  }
 0x127   :  { %v390_v59 = vmax.f32 %v344_v54, 0.0  ;;  %v392_v60 = vmax.f32 %v385_v55, 0.0  ;;  %v2203_v61 = vpack.c.bf16 %v391_v53, %v391_v53  ;;  %v2205_v4 = vpack.c.bf16 %v389_v56, %v389_v56  ;;  %v1981_v53 = vld [vmem:[#allocation10 + $0xb8] sm:$0xff]   ;;  %v1982_v55 = vld [vmem:[#allocation10 + $0xb0] sm:$0xff]   ;;  %v1983_v56 = vld [vmem:[#allocation10 + $0xa8] sm:$0xff]  }
 0x128   :  { %v346_v62 = vpop.f32.mrf.mxu0  ;;  %v387_v63 = vpop.f32.mrf.mxu1  ;;  %v2133_v54 = vmov 0.0   ;;  %v1984_v57 = vld [vmem:[#allocation10 + $0xa0] sm:$0xff]   ;;  %v1985_v58 = vld [vmem:[#allocation10 + $0x98] sm:$0xff]  }
 0x129   :  { %v394_v0 = vpack.c.bf16 %v390_v59, %v390_v59  ;;  %v396_v1 = vpack.c.bf16 %v392_v60, %v392_v60  ;;  %v1986_v59 = vld [vmem:[#allocation10 + $0x90] sm:$0xff]   ;;  %v1987_v60 = vld [vmem:[#allocation10 + $0x88] sm:$0xff]   ;;  %v525_v62 = vld [vmem:[%s2230_s4] sm:$0x7] }
 0x12a   :  { %v530_v63 = vrot.slane %v525_v62, %v129_v38 }
 0x12b   :  { %1086 = vmatprep.mubr.bf16.mxu0 %v394_v0  ;;  %1127 = vmatprep.mubr.bf16.mxu1 %v396_v1 }
 0x12c   :  { %1087 = vmatmul.mubr.bf16.vlgmr.msra.gmra.mxu0 %v2205_v4  ;;  %1128 = vmatmul.mubr.bf16.vlgmr.msra.gmra.mxu1 %v2203_v61 }
 0x12d   :  { %1680 = vmatpush3.bf16.msra.mxu0 %v1935_v2  ;;  %1702 = vmatpush3.bf16.msra.mxu1 %v1936_v3 }
 0x12e   :  { %1168 = vmatprep.mubr.bf16.mxu0 %v394_v0  ;;  %1208 = vmatprep.mubr.bf16.mxu1 %v396_v1  ;;  %v534_v0 = vrot.slane %v525_v62, %v133_v41 }
 0x12f   :  { %1681 = vmatprep.subr.bf16.mxu0 %v1937_v5  ;;  %1703 = vmatprep.subr.bf16.mxu1 %v1938_v6 }
 0x131   :  { %1682 = vmatpush3.bf16.msra.mxu0 %v1939_v7  ;;  %1704 = vmatpush3.bf16.msra.mxu1 %v1940_v8 }
 0x132   :  { %1683 = vmatprep.subr.bf16.mxu0 %v1941_v9  ;;  %1705 = vmatprep.subr.bf16.mxu1 %v1942_v10 }
 0x135   :  { %1684 = vmatpush3.bf16.msra.mxu0 %v1943_v11  ;;  %1706 = vmatpush3.bf16.msra.mxu1 %v1944_v12 }
 0x136   :  { %1685 = vmatprep.subr.bf16.mxu0 %v1945_v13  ;;  %1707 = vmatprep.subr.bf16.mxu1 %v1946_v14 }
 0x139   :  { %1686 = vmatpush3.bf16.msra.mxu0 %v1947_v15  ;;  %1708 = vmatpush3.bf16.msra.mxu1 %v1948_v16 }
 0x13a   :  { %1687 = vmatprep.subr.bf16.mxu0 %v1949_v17  ;;  %1709 = vmatprep.subr.bf16.mxu1 %v1950_v18  ;;  %v538_v17 = vrot.slane %v525_v62, %v137_v39 }
 0x13d   :  { %1688 = vmatpush3.bf16.msra.mxu0 %v1951_v19  ;;  %1710 = vmatpush3.bf16.msra.mxu1 %v1952_v20 }
 0x13e   :  { %1689 = vmatprep.subr.bf16.mxu0 %v1953_v21  ;;  %1711 = vmatprep.subr.bf16.mxu1 %v1954_v22 }
 0x141   :  { %1690 = vmatpush3.bf16.msra.mxu0 %v1955_v23  ;;  %1712 = vmatpush3.bf16.msra.mxu1 %v1956_v24 }
 0x142   :  { %1691 = vmatprep.subr.bf16.mxu0 %v1957_v25  ;;  %1713 = vmatprep.subr.bf16.mxu1 %v1958_v26 }
 0x145   :  { %1692 = vmatpush3.bf16.msra.mxu0 %v1959_v27  ;;  %1714 = vmatpush3.bf16.msra.mxu1 %v1960_v28 }
 0x146   :  { %1693 = vmatprep.subr.bf16.mxu0 %v1961_v29  ;;  %1715 = vmatprep.subr.bf16.mxu1 %v1962_v30 }
 0x149   :  { %1694 = vmatpush3.bf16.msra.mxu0 %v1963_v31  ;;  %1716 = vmatpush3.bf16.msra.mxu1 %v1964_v32 }
 0x14a   :  { %1723 = vmatprep.subr.bf16.mxu0 %v1965_v33  ;;  %1754 = vmatprep.subr.bf16.mxu1 %v2133_v54 }
 0x14c   :  { %1169 = vmatmul.mubr.bf16.vlgmr.msra.gmra.mxu0 %v2205_v4  ;;  %1209 = vmatmul.mubr.bf16.vlgmr.msra.gmra.mxu1 %v2203_v61  ;;  %v1988_v61 = vld [vmem:[#allocation10 + $0x80] sm:$0xff]  }
 0x14d   :  { %1724 = vmatpush3.bf16.msra.mxu0 %v1966_v34  ;;  %1755 = vmatpush3.bf16.msra.mxu1 %v1981_v53 }
 0x14e   :  { %1725 = vmatprep.subr.bf16.mxu0 %v1967_v35  ;;  %1756 = vmatprep.subr.bf16.mxu1 %v2133_v54 }
 0x14f   :  { %1770 = vmatprep.mubr.msk.bf16.mxu1 %vm2134_vm0, %v2133_v54 }
 0x151   :  { %1726 = vmatpush3.bf16.msra.mxu0 %v1968_v36  ;;  %1757 = vmatpush3.bf16.msra.mxu1 %v1982_v55 }
 0x152   :  { %1727 = vmatprep.subr.bf16.mxu0 %v1969_v40  ;;  %1758 = vmatprep.subr.bf16.mxu1 %v2133_v54 }
 0x155   :  { %1728 = vmatpush3.bf16.msra.mxu0 %v1970_v42  ;;  %1759 = vmatpush3.bf16.msra.mxu1 %v1983_v56 }
 0x156   :  { %1729 = vmatprep.subr.bf16.mxu0 %v1971_v43  ;;  %1760 = vmatprep.subr.bf16.mxu1 %v2133_v54 }
 0x159   :  { %1730 = vmatpush3.bf16.msra.mxu0 %v1972_v44  ;;  %1761 = vmatpush3.bf16.msra.mxu1 %v1984_v57 }
 0x15a   :  { %1731 = vmatprep.subr.bf16.mxu0 %v1973_v45  ;;  %1762 = vmatprep.subr.bf16.mxu1 %v2133_v54 }
 0x15d   :  { %1732 = vmatpush3.bf16.msra.mxu0 %v1974_v46  ;;  %1763 = vmatpush3.bf16.msra.mxu1 %v1985_v58 }
 0x15e   :  { %1733 = vmatprep.subr.bf16.mxu0 %v1975_v47  ;;  %1764 = vmatprep.subr.bf16.mxu1 %v2133_v54 }
 0x161   :  { %1734 = vmatpush3.bf16.msra.mxu0 %v1976_v48  ;;  %1765 = vmatpush3.bf16.msra.mxu1 %v1986_v59 }
 0x162   :  { %1735 = vmatprep.subr.bf16.mxu0 %v1977_v49  ;;  %1766 = vmatprep.subr.bf16.mxu1 %v2133_v54 }
 0x165   :  { %1736 = vmatpush3.bf16.msra.mxu0 %v1978_v50  ;;  %1767 = vmatpush3.bf16.msra.mxu1 %v1987_v60 }
 0x166   :  { %1737 = vmatprep.subr.bf16.mxu0 %v1979_v51  ;;  %1768 = vmatprep.subr.bf16.mxu1 %v2133_v54 }
 0x169   :  { %1738 = vmatpush3.bf16.msra.mxu0 %v1980_v52  ;;  %1769 = vmatpush3.bf16.msra.mxu1 %v1988_v61 }
 0x1ec   :  { %v1088_v1 = vpop.f32.mrf.mxu0  ;;  %v1129_v2 = vpop.f32.mrf.mxu1 }
 0x1ed   :  { %v1089_v3 = vadd.f32 %v1088_v1, %v530_v63 }
 0x1ee   :  { %v1090_v4 = vpop.f32.mrf.mxu0  ;;  %v1131_v5 = vpop.f32.mrf.mxu1 }
 0x1ef   :  { %v1130_v6 = vadd.f32 %v1129_v2, %v1089_v3  ;;  %v1091_v7 = vadd.f32 %v1090_v4, %v534_v0 }
 0x1f0   :  { %v1092_v8 = vpop.f32.mrf.mxu0  ;;  %v1133_v9 = vpop.f32.mrf.mxu1 }
 0x1f1   :  { %v1132_v10 = vadd.f32 %v1131_v5, %v1091_v7  ;;  %v1216_v11 = vmax.f32 %v1130_v6, 0.0 }
 0x1f2   :  { %v1093_v12 = vpop.f32.mrf.mxu0  ;;  %v1134_v13 = vpop.f32.mrf.mxu1 }
 0x1f3   :  { %v1217_v14 = vmax.f32 %v1132_v10, 0.0  ;;  %v1219_v16 = vpack.c.bf16 %v1216_v11, %v1216_v11 }
 0x1f5   :  { %v1220_v15 = vpack.c.bf16 %v1217_v14, %v1217_v14 }
 0x1f7   :  { %1453 = vmatprep.mubr.bf16.mxu0 %v1220_v15 }
 0x1f8   :  { %1454 = vmatmul.mubr.bf16.vlgmr.msra.gmra.mxu0 %v1219_v16 }
 0x20c   :  { %v1695_v38 = vpop.f32.mrf.mxu0  ;;  %v1717_v41 = vpop.f32.mrf.mxu1 }
 0x20e   :  { %v1696_v18 = vpop.f32.mrf.mxu0  ;;  %v1718_v19 = vpop.f32.mrf.mxu1 }
 0x20f   :  { %v1697_v20 = vadd.f32 %v1696_v18, %v1695_v38  ;;  %v1719_v24 = vadd.f32 %v1718_v19, %v1717_v41 }
 0x210   :  { %v1698_v21 = vpop.f32.mrf.mxu0  ;;  %v1720_v22 = vpop.f32.mrf.mxu1 }
 0x211   :  { %v1171_v23 = vadd.f32 %v1697_v20, %v538_v17 }
 0x212   :  { %v1699_v25 = vpop.f32.mrf.mxu0  ;;  %v1721_v26 = vpop.f32.mrf.mxu1 }
 0x213   :  { %v1211_v27 = vadd.f32 %v1719_v24, %v1171_v23 }
 0x215   :  { %v1218_v28 = vmax.f32 %v1211_v27, 0.0 }
 0x217   :  { %v1221_v29 = vpack.c.bf16 %v1218_v28, %v1218_v28 }
 0x219   :  { %1771 = vmatmul.mubr.bf16.vlgmr.msra.gmra.mxu1 %v1221_v29 }
 0x2b8   :  { %v1739_v30 = vpop.f32.mrf.mxu0 }
 0x2ba   :  { %v1740_v31 = vpop.f32.mrf.mxu0 }
 0x2bb   :  { %v1741_v34 = vadd.f32 %v1740_v31, %v1739_v30 }
 0x2bc   :  { %v1742_v32 = vpop.f32.mrf.mxu0 }
 0x2bd   :  { %v1456_v39 = vadd.f32 %v1741_v34, %v1653_v37 }
 0x2be   :  { %v1743_v33 = vpop.f32.mrf.mxu0 }
 0x2d9   :  { %v1495_v35 = vpop.f32.mrf.mxu1 }
 0x2da   :  { %v1496_v36 = vadd.f32 %v1495_v35, %v1456_v39 }
 0x2db   :  { %v1772_v40 = vpop.f32.mrf.mxu1 }
 0x2dc   :  { %v1678_v42 = vmul.f32 -1.442695, %v1496_v36 }
 0x2dd   :  { %v1498_v43 = vpop.f32.mrf.mxu1 }
 0x2de   :  { %1989 = vpow2.f32 %v1678_v42 }
 0x2df   :  { %v1773_v44 = vpop.f32.mrf.mxu1 }
 0x2eb   :  { %v1990_v45 = vpop.eup %1989 }
 0x2ec   :  { %v1504_v46 = vadd.f32 1.0, %v1990_v45 }
 0x2ee   :  { %1991 = vrcp.f32 %v1504_v46 }
 0x2fb   :  { %v1992_v47 = vpop.eup %1991 }
 0x2fc   :  { %1507 = vst [vmem:[#allocation11] sm:$0xff] %v1992_v47 }
 0x2fd   :  { %2104 = shalt.err (!%p2101_p1)
}
 0x2fe   :  { %1517 = dma.vmem_to_hbm [thread:$0]  %s1515_s8, 128, %s2233_s7, [#allocation4]  }
 0x2ff   :  { %2119 = dma.done.wait [#allocation4], 128  }
 0x300   :  { %2120 = vsyncadd [#allocation4], 4294967168 }
 0x301   :  { %1521 = vsyncpa [#allocation3], 1 }
 0x302   :  { %1522 = vsyncpa [#allocation6], 1 }
 0x303   :  { %1523 = vsyncpa [#allocation9], 1 }
 0x304   :  { %1524 = vsyncpa [#allocation4], 1 }

</bundles_post_ra>
